<compile_context>
chip_gen: v6e
topology: v6e:2x2x1
jax: 0.10.0
libtpu: 0.0.40
codegen_flags: <defaults>
</compile_context>

<pallas_src>
import functools

import jax
import jax.numpy as jnp
from jax.experimental import pallas as pl
from jax.experimental.pallas import tpu as pltpu


# ------------------------------ fused kernel ---------------------------------
def _fused_lstm_head_kernel(*refs, num_layers, hidden_size, seq_len, batch):
    """Whole forward pass in one kernel invocation (no grid).

    refs (in order):
      x_ref        (T*B, F)      time-major flattened input
      h0_ref       (L, B, H)     initial hidden states
      c0_ref       (L, B, H)     initial cell states
      per layer l: w_ih_t (F_in, 4H), w_hh_t (H, 4H), bias (1, 4H)
                   with gate column order [i, f, o, g]
      lin_w_ref    (H, O_pad)    head weight (zero-padded to 128 lanes)
      lin_b_ref    (1, O_pad)    head bias  (zero-padded)
      out_ref      (B, O_pad)    output (padded; wrapper slices)
      seq_ref      (T*B, H)      VMEM scratch: current layer's output sequence
    """
    H = hidden_size
    T = seq_len
    B = batch

    it = iter(refs)
    x_ref = next(it)
    h0_ref = next(it)
    c0_ref = next(it)
    layer_refs = [(next(it), next(it), next(it)) for _ in range(num_layers)]
    lin_w_ref = next(it)
    lin_b_ref = next(it)
    out_ref = next(it)
    seq_ref = next(it)

    layer_in = x_ref[...]                        # (T*B, F_in)
    h = None
    for layer in range(num_layers):
        w_ih_ref, w_hh_ref, b_ref = layer_refs[layer]
        w_hh = w_hh_ref[...]                     # (H, 4H), resident across steps

        # Hoisted input projection + bias for the whole sequence (M = T*B).
        gates_x = (jnp.dot(layer_in, w_ih_ref[...],
                           preferred_element_type=jnp.float32)
                   + b_ref[...])                 # (T*B, 4H)

        h = h0_ref[layer]                        # (B, H)
        c = c0_ref[layer]                        # (B, H)
        last_layer = layer == num_layers - 1

        for t in range(T):                       # fully unrolled, T is small
            gates = gates_x[t * B:(t + 1) * B, :] + jnp.dot(
                h, w_hh, preferred_element_type=jnp.float32)     # (B, 4H)
            # [i | f | o] share one contiguous sigmoid slab; g is the tanh slab.
            sig = jax.nn.sigmoid(gates[:, :3 * H])
            g_g = jnp.tanh(gates[:, 3 * H:])
            i_g = sig[:, 0 * H:1 * H]
            f_g = sig[:, 1 * H:2 * H]
            o_g = sig[:, 2 * H:3 * H]
            c = f_g * c + i_g * g_g
            h = o_g * jnp.tanh(c)
            if not last_layer:
                seq_ref[pl.ds(t * B, B), :] = h  # feed the next layer

        if not last_layer:
            layer_in = seq_ref[...]              # (T*B, H)

    # Head on the final hidden state of the top layer
    # (== linear(lstm_output)[:, -1, :] in the PyTorch module).
    out_ref[...] = (jnp.dot(h, lin_w_ref[...],
                            preferred_element_type=jnp.float32)
                    + lin_b_ref[...])


# ------------------------------- wrapper --------------------------------------
def _full_spec(shape):
    n = len(shape)
    return pl.BlockSpec(shape, lambda *_: (0,) * n)


def fused_lstm_forward(x_bt_f, h0, c0, layer_params, lin_w_t_pad, lin_b_pad):
    """x_bt_f: (B, T, F) batch_first input. Returns padded (B, O_pad) preds."""
    B, T, F = x_bt_f.shape
    L, _, H = h0.shape
    O_pad = lin_w_t_pad.shape[-1]

    # batch_first -> time-major rows so each timestep is a contiguous (B, F) slab.
    x_tb = jnp.transpose(x_bt_f.astype(jnp.float32), (1, 0, 2)).reshape(T * B, F)

    inputs = [x_tb, h0, c0]
    for p in layer_params:
        inputs += [p["w_ih_t"], p["w_hh_t"], p["bias"]]
    inputs += [lin_w_t_pad, lin_b_pad]

    kernel = functools.partial(_fused_lstm_head_kernel,
                               num_layers=L, hidden_size=H,
                               seq_len=T, batch=B)

    return pl.pallas_call(
        kernel,
        out_shape=jax.ShapeDtypeStruct((B, O_pad), jnp.float32),
        in_specs=[_full_spec(x.shape) for x in inputs],
        out_specs=_full_spec((B, O_pad)),
        scratch_shapes=[pltpu.VMEM((T * B, H), jnp.float32)],
    )(*inputs)


# ------------------------------- full module -----------------------------------
class LSTMModel:
    """JAX/Pallas re-implementation of the PyTorch LSTM module forward pass."""

    def __init__(self, input_size, hidden_size, num_layers, output_size,
                 batch_size, key):
        self.input_size = input_size
        self.hidden_size = hidden_size
        self.num_layers = num_layers
        self.output_size = output_size
        self.batch_size = batch_size

        H = hidden_size
        k = 1.0 / float(hidden_size) ** 0.5
        keys = jax.random.split(key, 4 * num_layers + 2)

        # Permutation reordering PyTorch gate blocks [i, f, g, o] -> [i, f, o, g]
        # so the three sigmoid gates are one contiguous slab in the kernel.
        perm = jnp.concatenate([
            jnp.arange(0 * H, 1 * H),    # i
            jnp.arange(1 * H, 2 * H),    # f
            jnp.arange(3 * H, 4 * H),    # o
            jnp.arange(2 * H, 3 * H),    # g
        ])

        self.layers = []
        for layer in range(num_layers):
            in_f = input_size if layer == 0 else hidden_size
            kw = keys[4 * layer:4 * layer + 4]
            w_ih = jax.random.uniform(kw[0], (4 * H, in_f), jnp.float32, -k, k)
            w_hh = jax.random.uniform(kw[1], (4 * H, H), jnp.float32, -k, k)
            b_ih = jax.random.uniform(kw[2], (4 * H,), jnp.float32, -k, k)
            b_hh = jax.random.uniform(kw[3], (4 * H,), jnp.float32, -k, k)
            self.layers.append(dict(
                w_ih_t=w_ih[perm].T,                            # (in_f, 4H) [i,f,o,g]
                w_hh_t=w_hh[perm].T,                            # (H,   4H) [i,f,o,g]
                bias=(b_ih + b_hh)[perm].reshape(1, 4 * H),     # (1,   4H)
            ))

        # Linear head, zero-padded to a 128-lane-multiple output width so the
        # final store is unmasked; the wrapper slices back to output_size.
        O_pad = ((output_size + 127) // 128) * 128
        lin_w = jax.random.uniform(keys[-2], (output_size, H), jnp.float32, -k, k)
        lin_b = jax.random.uniform(keys[-1], (output_size,), jnp.float32, -k, k)
        self.lin_w_t_pad = (jnp.zeros((H, O_pad), jnp.float32)
                            .at[:, :output_size].set(lin_w.T))
        self.lin_b_pad = (jnp.zeros((1, O_pad), jnp.float32)
                          .at[:, :output_size].set(lin_b))

    def __call__(self, input_seq, state_key):
        # input_seq: (B, T, input_size), batch_first like PyTorch.
        # The PyTorch module draws random h_0/c_0 every forward (torch.randn);
        # we reproduce that with a JAX key for determinism.
        kh, kc = jax.random.split(state_key)
        h_0 = jax.random.normal(
            kh, (self.num_layers, self.batch_size, self.hidden_size), jnp.float32)
        c_0 = jax.random.normal(
            kc, (self.num_layers, self.batch_size, self.hidden_size), jnp.float32)

        pred_pad = fused_lstm_forward(input_seq, h_0, c_0, self.layers,
                                      self.lin_w_t_pad, self.lin_b_pad)
        return pred_pad[:, :self.output_size]


# ----------------------------------- main ---------------------------------------
if __name__ == "__main__":
    input_size = 4
    hidden_size = 32
    num_layers = 2
    output_size = 1
    batch_size = 2
    seq_len = 8

    root = jax.random.PRNGKey(0)
    k_params, k_input, k_state = jax.random.split(root, 3)

    model = LSTMModel(input_size, hidden_size, num_layers, output_size,
                      batch_size, k_params)
    input_seq = jax.random.normal(k_input, (batch_size, seq_len, input_size),
                                  jnp.float32)

    pred = model(input_seq, k_state)
    jax.block_until_ready(pred)
    assert pred.shape == (batch_size, output_size)
    print("KERNEL_OK")
</pallas_src>

<mosaic_0001>
module attributes {stable_mosaic.version = 11 : i64} {
  func.func @_fused_lstm_head_kernel(%arg0: memref<16x4xf32, #tpu.memory_space<vmem>>, %arg1: memref<2x2x32xf32, #tpu.memory_space<vmem>>, %arg2: memref<2x2x32xf32, #tpu.memory_space<vmem>>, %arg3: memref<4x128xf32, #tpu.memory_space<vmem>>, %arg4: memref<32x128xf32, #tpu.memory_space<vmem>>, %arg5: memref<1x128xf32, #tpu.memory_space<vmem>>, %arg6: memref<32x128xf32, #tpu.memory_space<vmem>>, %arg7: memref<32x128xf32, #tpu.memory_space<vmem>>, %arg8: memref<1x128xf32, #tpu.memory_space<vmem>>, %arg9: memref<32x128xf32, #tpu.memory_space<vmem>>, %arg10: memref<1x128xf32, #tpu.memory_space<vmem>>, %arg11: memref<2x128xf32, #tpu.memory_space<vmem>>, %arg12: memref<16x32xf32, #tpu.memory_space<vmem>>) attributes {dimension_semantics = [], scalar_prefetch = 0 : i64, scratch_operands = 1 : i64, tpu.core_type = #tpu.core_type<tc>} {
    %c0 = arith.constant 0 : index
    %c0_0 = arith.constant 0 : index
    %0 = vector.load %arg0[%c0, %c0_0] : memref<16x4xf32, #tpu.memory_space<vmem>>, vector<16x4xf32>
    %c0_1 = arith.constant 0 : index
    %c0_2 = arith.constant 0 : index
    %1 = vector.load %arg4[%c0_1, %c0_2] : memref<32x128xf32, #tpu.memory_space<vmem>>, vector<32x128xf32>
    %c0_3 = arith.constant 0 : index
    %c0_4 = arith.constant 0 : index
    %2 = vector.load %arg3[%c0_3, %c0_4] : memref<4x128xf32, #tpu.memory_space<vmem>>, vector<4x128xf32>
    %cst = arith.constant dense<0.000000e+00> : vector<16x128xf32>
    %3 = tpu.matmul %0, %2, %cst {dimension_numbers = #tpu.dot_dimension_numbers<[1], [0], [0], [1], [0, 0, 1, 1], [], []>} : vector<16x4xf32>, vector<4x128xf32>, vector<16x128xf32> -> vector<16x128xf32>
    %c0_5 = arith.constant 0 : index
    %c0_6 = arith.constant 0 : index
    %4 = vector.load %arg5[%c0_5, %c0_6] : memref<1x128xf32, #tpu.memory_space<vmem>>, vector<1x128xf32>
    %5 = vector.broadcast %4 : vector<1x128xf32> to vector<16x128xf32>
    %6 = arith.addf %3, %5 : vector<16x128xf32>
    %c0_7 = arith.constant 0 : index
    %c0_8 = arith.constant 0 : index
    %c0_9 = arith.constant 0 : index
    %7 = vector.load %arg1[%c0_7, %c0_8, %c0_9] : memref<2x2x32xf32, #tpu.memory_space<vmem>>, vector<1x2x32xf32>
    %8 = vector.shape_cast %7 : vector<1x2x32xf32> to vector<2x32xf32>
    %c0_10 = arith.constant 0 : index
    %c0_11 = arith.constant 0 : index
    %c0_12 = arith.constant 0 : index
    %9 = vector.load %arg2[%c0_10, %c0_11, %c0_12] : memref<2x2x32xf32, #tpu.memory_space<vmem>>, vector<1x2x32xf32>
    %10 = vector.shape_cast %9 : vector<1x2x32xf32> to vector<2x32xf32>
    %11 = vector.extract_strided_slice %6 {offsets = [0, 0], sizes = [2, 128], strides = [1, 1]} : vector<16x128xf32> to vector<2x128xf32>
    %cst_13 = arith.constant dense<0.000000e+00> : vector<2x128xf32>
    %12 = tpu.matmul %8, %1, %cst_13 {dimension_numbers = #tpu.dot_dimension_numbers<[1], [0], [0], [1], [0, 0, 1, 1], [], []>} : vector<2x32xf32>, vector<32x128xf32>, vector<2x128xf32> -> vector<2x128xf32>
    %13 = arith.addf %11, %12 : vector<2x128xf32>
    %14 = vector.extract_strided_slice %13 {offsets = [0, 0], sizes = [2, 96], strides = [1, 1]} : vector<2x128xf32> to vector<2x96xf32>
    %15 = arith.negf %14 : vector<2x96xf32>
    %16 = math.exp %15 : vector<2x96xf32>
    %cst_14 = arith.constant 1.000000e+00 : f32
    %17 = vector.broadcast %cst_14 : f32 to vector<2x96xf32>
    %18 = arith.addf %17, %16 : vector<2x96xf32>
    %19 = arith.divf %17, %18 : vector<2x96xf32>
    %20 = vector.extract_strided_slice %13 {offsets = [0, 96], sizes = [2, 32], strides = [1, 1]} : vector<2x128xf32> to vector<2x32xf32>
    %21 = math.tanh %20 : vector<2x32xf32>
    %22 = vector.extract_strided_slice %19 {offsets = [0, 0], sizes = [2, 32], strides = [1, 1]} : vector<2x96xf32> to vector<2x32xf32>
    %23 = vector.extract_strided_slice %19 {offsets = [0, 32], sizes = [2, 32], strides = [1, 1]} : vector<2x96xf32> to vector<2x32xf32>
    %24 = vector.extract_strided_slice %19 {offsets = [0, 64], sizes = [2, 32], strides = [1, 1]} : vector<2x96xf32> to vector<2x32xf32>
    %25 = arith.mulf %23, %10 : vector<2x32xf32>
    %26 = arith.mulf %22, %21 : vector<2x32xf32>
    %27 = arith.addf %25, %26 : vector<2x32xf32>
    %28 = math.tanh %27 : vector<2x32xf32>
    %29 = arith.mulf %24, %28 : vector<2x32xf32>
    %c0_15 = arith.constant 0 : index
    %c0_16 = arith.constant 0 : index
    %30 = vector.load %arg12[%c0_15, %c0_16] : memref<16x32xf32, #tpu.memory_space<vmem>>, vector<2x32xf32>
    tpu.vector_store %arg12[%c0_15, %c0_16], %29 {strides = array<i32>} : memref<16x32xf32, #tpu.memory_space<vmem>>, vector<2x32xf32>,
    %31 = vector.extract_strided_slice %6 {offsets = [2, 0], sizes = [2, 128], strides = [1, 1]} : vector<16x128xf32> to vector<2x128xf32>
    %cst_17 = arith.constant dense<0.000000e+00> : vector<2x128xf32>
    %32 = tpu.matmul %29, %1, %cst_17 {dimension_numbers = #tpu.dot_dimension_numbers<[1], [0], [0], [1], [0, 0, 1, 1], [], []>} : vector<2x32xf32>, vector<32x128xf32>, vector<2x128xf32> -> vector<2x128xf32>
    %33 = arith.addf %31, %32 : vector<2x128xf32>
    %34 = vector.extract_strided_slice %33 {offsets = [0, 0], sizes = [2, 96], strides = [1, 1]} : vector<2x128xf32> to vector<2x96xf32>
    %35 = arith.negf %34 : vector<2x96xf32>
    %36 = math.exp %35 : vector<2x96xf32>
    %cst_18 = arith.constant 1.000000e+00 : f32
    %37 = vector.broadcast %cst_18 : f32 to vector<2x96xf32>
    %38 = arith.addf %37, %36 : vector<2x96xf32>
    %39 = arith.divf %37, %38 : vector<2x96xf32>
    %40 = vector.extract_strided_slice %33 {offsets = [0, 96], sizes = [2, 32], strides = [1, 1]} : vector<2x128xf32> to vector<2x32xf32>
    %41 = math.tanh %40 : vector<2x32xf32>
    %42 = vector.extract_strided_slice %39 {offsets = [0, 0], sizes = [2, 32], strides = [1, 1]} : vector<2x96xf32> to vector<2x32xf32>
    %43 = vector.extract_strided_slice %39 {offsets = [0, 32], sizes = [2, 32], strides = [1, 1]} : vector<2x96xf32> to vector<2x32xf32>
    %44 = vector.extract_strided_slice %39 {offsets = [0, 64], sizes = [2, 32], strides = [1, 1]} : vector<2x96xf32> to vector<2x32xf32>
    %45 = arith.mulf %43, %27 : vector<2x32xf32>
    %46 = arith.mulf %42, %41 : vector<2x32xf32>
    %47 = arith.addf %45, %46 : vector<2x32xf32>
    %48 = math.tanh %47 : vector<2x32xf32>
    %49 = arith.mulf %44, %48 : vector<2x32xf32>
    %c2 = arith.constant 2 : index
    %c0_19 = arith.constant 0 : index
    %50 = vector.load %arg12[%c2, %c0_19] : memref<16x32xf32, #tpu.memory_space<vmem>>, vector<2x32xf32>
    tpu.vector_store %arg12[%c2, %c0_19], %49 {strides = array<i32>} : memref<16x32xf32, #tpu.memory_space<vmem>>, vector<2x32xf32>,
    %51 = vector.extract_strided_slice %6 {offsets = [4, 0], sizes = [2, 128], strides = [1, 1]} : vector<16x128xf32> to vector<2x128xf32>
    %cst_20 = arith.constant dense<0.000000e+00> : vector<2x128xf32>
    %52 = tpu.matmul %49, %1, %cst_20 {dimension_numbers = #tpu.dot_dimension_numbers<[1], [0], [0], [1], [0, 0, 1, 1], [], []>} : vector<2x32xf32>, vector<32x128xf32>, vector<2x128xf32> -> vector<2x128xf32>
    %53 = arith.addf %51, %52 : vector<2x128xf32>
    %54 = vector.extract_strided_slice %53 {offsets = [0, 0], sizes = [2, 96], strides = [1, 1]} : vector<2x128xf32> to vector<2x96xf32>
    %55 = arith.negf %54 : vector<2x96xf32>
    %56 = math.exp %55 : vector<2x96xf32>
    %cst_21 = arith.constant 1.000000e+00 : f32
    %57 = vector.broadcast %cst_21 : f32 to vector<2x96xf32>
    %58 = arith.addf %57, %56 : vector<2x96xf32>
    %59 = arith.divf %57, %58 : vector<2x96xf32>
    %60 = vector.extract_strided_slice %53 {offsets = [0, 96], sizes = [2, 32], strides = [1, 1]} : vector<2x128xf32> to vector<2x32xf32>
    %61 = math.tanh %60 : vector<2x32xf32>
    %62 = vector.extract_strided_slice %59 {offsets = [0, 0], sizes = [2, 32], strides = [1, 1]} : vector<2x96xf32> to vector<2x32xf32>
    %63 = vector.extract_strided_slice %59 {offsets = [0, 32], sizes = [2, 32], strides = [1, 1]} : vector<2x96xf32> to vector<2x32xf32>
    %64 = vector.extract_strided_slice %59 {offsets = [0, 64], sizes = [2, 32], strides = [1, 1]} : vector<2x96xf32> to vector<2x32xf32>
    %65 = arith.mulf %63, %47 : vector<2x32xf32>
    %66 = arith.mulf %62, %61 : vector<2x32xf32>
    %67 = arith.addf %65, %66 : vector<2x32xf32>
    %68 = math.tanh %67 : vector<2x32xf32>
    %69 = arith.mulf %64, %68 : vector<2x32xf32>
    %c4 = arith.constant 4 : index
    %c0_22 = arith.constant 0 : index
    %70 = vector.load %arg12[%c4, %c0_22] : memref<16x32xf32, #tpu.memory_space<vmem>>, vector<2x32xf32>
    tpu.vector_store %arg12[%c4, %c0_22], %69 {strides = array<i32>} : memref<16x32xf32, #tpu.memory_space<vmem>>, vector<2x32xf32>,
    %71 = vector.extract_strided_slice %6 {offsets = [6, 0], sizes = [2, 128], strides = [1, 1]} : vector<16x128xf32> to vector<2x128xf32>
    %cst_23 = arith.constant dense<0.000000e+00> : vector<2x128xf32>
    %72 = tpu.matmul %69, %1, %cst_23 {dimension_numbers = #tpu.dot_dimension_numbers<[1], [0], [0], [1], [0, 0, 1, 1], [], []>} : vector<2x32xf32>, vector<32x128xf32>, vector<2x128xf32> -> vector<2x128xf32>
    %73 = arith.addf %71, %72 : vector<2x128xf32>
    %74 = vector.extract_strided_slice %73 {offsets = [0, 0], sizes = [2, 96], strides = [1, 1]} : vector<2x128xf32> to vector<2x96xf32>
    %75 = arith.negf %74 : vector<2x96xf32>
    %76 = math.exp %75 : vector<2x96xf32>
    %cst_24 = arith.constant 1.000000e+00 : f32
    %77 = vector.broadcast %cst_24 : f32 to vector<2x96xf32>
    %78 = arith.addf %77, %76 : vector<2x96xf32>
    %79 = arith.divf %77, %78 : vector<2x96xf32>
    %80 = vector.extract_strided_slice %73 {offsets = [0, 96], sizes = [2, 32], strides = [1, 1]} : vector<2x128xf32> to vector<2x32xf32>
    %81 = math.tanh %80 : vector<2x32xf32>
    %82 = vector.extract_strided_slice %79 {offsets = [0, 0], sizes = [2, 32], strides = [1, 1]} : vector<2x96xf32> to vector<2x32xf32>
    %83 = vector.extract_strided_slice %79 {offsets = [0, 32], sizes = [2, 32], strides = [1, 1]} : vector<2x96xf32> to vector<2x32xf32>
    %84 = vector.extract_strided_slice %79 {offsets = [0, 64], sizes = [2, 32], strides = [1, 1]} : vector<2x96xf32> to vector<2x32xf32>
    %85 = arith.mulf %83, %67 : vector<2x32xf32>
    %86 = arith.mulf %82, %81 : vector<2x32xf32>
    %87 = arith.addf %85, %86 : vector<2x32xf32>
    %88 = math.tanh %87 : vector<2x32xf32>
    %89 = arith.mulf %84, %88 : vector<2x32xf32>
    %c6 = arith.constant 6 : index
    %c0_25 = arith.constant 0 : index
    %90 = vector.load %arg12[%c6, %c0_25] : memref<16x32xf32, #tpu.memory_space<vmem>>, vector<2x32xf32>
    tpu.vector_store %arg12[%c6, %c0_25], %89 {strides = array<i32>} : memref<16x32xf32, #tpu.memory_space<vmem>>, vector<2x32xf32>,
    %91 = vector.extract_strided_slice %6 {offsets = [8, 0], sizes = [2, 128], strides = [1, 1]} : vector<16x128xf32> to vector<2x128xf32>
    %cst_26 = arith.constant dense<0.000000e+00> : vector<2x128xf32>
    %92 = tpu.matmul %89, %1, %cst_26 {dimension_numbers = #tpu.dot_dimension_numbers<[1], [0], [0], [1], [0, 0, 1, 1], [], []>} : vector<2x32xf32>, vector<32x128xf32>, vector<2x128xf32> -> vector<2x128xf32>
    %93 = arith.addf %91, %92 : vector<2x128xf32>
    %94 = vector.extract_strided_slice %93 {offsets = [0, 0], sizes = [2, 96], strides = [1, 1]} : vector<2x128xf32> to vector<2x96xf32>
    %95 = arith.negf %94 : vector<2x96xf32>
    %96 = math.exp %95 : vector<2x96xf32>
    %cst_27 = arith.constant 1.000000e+00 : f32
    %97 = vector.broadcast %cst_27 : f32 to vector<2x96xf32>
    %98 = arith.addf %97, %96 : vector<2x96xf32>
    %99 = arith.divf %97, %98 : vector<2x96xf32>
    %100 = vector.extract_strided_slice %93 {offsets = [0, 96], sizes = [2, 32], strides = [1, 1]} : vector<2x128xf32> to vector<2x32xf32>
    %101 = math.tanh %100 : vector<2x32xf32>
    %102 = vector.extract_strided_slice %99 {offsets = [0, 0], sizes = [2, 32], strides = [1, 1]} : vector<2x96xf32> to vector<2x32xf32>
    %103 = vector.extract_strided_slice %99 {offsets = [0, 32], sizes = [2, 32], strides = [1, 1]} : vector<2x96xf32> to vector<2x32xf32>
    %104 = vector.extract_strided_slice %99 {offsets = [0, 64], sizes = [2, 32], strides = [1, 1]} : vector<2x96xf32> to vector<2x32xf32>
    %105 = arith.mulf %103, %87 : vector<2x32xf32>
    %106 = arith.mulf %102, %101 : vector<2x32xf32>
    %107 = arith.addf %105, %106 : vector<2x32xf32>
    %108 = math.tanh %107 : vector<2x32xf32>
    %109 = arith.mulf %104, %108 : vector<2x32xf32>
    %c8 = arith.constant 8 : index
    %c0_28 = arith.constant 0 : index
    %110 = vector.load %arg12[%c8, %c0_28] : memref<16x32xf32, #tpu.memory_space<vmem>>, vector<2x32xf32>
    tpu.vector_store %arg12[%c8, %c0_28], %109 {strides = array<i32>} : memref<16x32xf32, #tpu.memory_space<vmem>>, vector<2x32xf32>,
    %111 = vector.extract_strided_slice %6 {offsets = [10, 0], sizes = [2, 128], strides = [1, 1]} : vector<16x128xf32> to vector<2x128xf32>
    %cst_29 = arith.constant dense<0.000000e+00> : vector<2x128xf32>
    %112 = tpu.matmul %109, %1, %cst_29 {dimension_numbers = #tpu.dot_dimension_numbers<[1], [0], [0], [1], [0, 0, 1, 1], [], []>} : vector<2x32xf32>, vector<32x128xf32>, vector<2x128xf32> -> vector<2x128xf32>
    %113 = arith.addf %111, %112 : vector<2x128xf32>
    %114 = vector.extract_strided_slice %113 {offsets = [0, 0], sizes = [2, 96], strides = [1, 1]} : vector<2x128xf32> to vector<2x96xf32>
    %115 = arith.negf %114 : vector<2x96xf32>
    %116 = math.exp %115 : vector<2x96xf32>
    %cst_30 = arith.constant 1.000000e+00 : f32
    %117 = vector.broadcast %cst_30 : f32 to vector<2x96xf32>
    %118 = arith.addf %117, %116 : vector<2x96xf32>
    %119 = arith.divf %117, %118 : vector<2x96xf32>
    %120 = vector.extract_strided_slice %113 {offsets = [0, 96], sizes = [2, 32], strides = [1, 1]} : vector<2x128xf32> to vector<2x32xf32>
    %121 = math.tanh %120 : vector<2x32xf32>
    %122 = vector.extract_strided_slice %119 {offsets = [0, 0], sizes = [2, 32], strides = [1, 1]} : vector<2x96xf32> to vector<2x32xf32>
    %123 = vector.extract_strided_slice %119 {offsets = [0, 32], sizes = [2, 32], strides = [1, 1]} : vector<2x96xf32> to vector<2x32xf32>
    %124 = vector.extract_strided_slice %119 {offsets = [0, 64], sizes = [2, 32], strides = [1, 1]} : vector<2x96xf32> to vector<2x32xf32>
    %125 = arith.mulf %123, %107 : vector<2x32xf32>
    %126 = arith.mulf %122, %121 : vector<2x32xf32>
    %127 = arith.addf %125, %126 : vector<2x32xf32>
    %128 = math.tanh %127 : vector<2x32xf32>
    %129 = arith.mulf %124, %128 : vector<2x32xf32>
    %c10 = arith.constant 10 : index
    %c0_31 = arith.constant 0 : index
    %130 = vector.load %arg12[%c10, %c0_31] : memref<16x32xf32, #tpu.memory_space<vmem>>, vector<2x32xf32>
    tpu.vector_store %arg12[%c10, %c0_31], %129 {strides = array<i32>} : memref<16x32xf32, #tpu.memory_space<vmem>>, vector<2x32xf32>,
    %131 = vector.extract_strided_slice %6 {offsets = [12, 0], sizes = [2, 128], strides = [1, 1]} : vector<16x128xf32> to vector<2x128xf32>
    %cst_32 = arith.constant dense<0.000000e+00> : vector<2x128xf32>
    %132 = tpu.matmul %129, %1, %cst_32 {dimension_numbers = #tpu.dot_dimension_numbers<[1], [0], [0], [1], [0, 0, 1, 1], [], []>} : vector<2x32xf32>, vector<32x128xf32>, vector<2x128xf32> -> vector<2x128xf32>
    %133 = arith.addf %131, %132 : vector<2x128xf32>
    %134 = vector.extract_strided_slice %133 {offsets = [0, 0], sizes = [2, 96], strides = [1, 1]} : vector<2x128xf32> to vector<2x96xf32>
    %135 = arith.negf %134 : vector<2x96xf32>
    %136 = math.exp %135 : vector<2x96xf32>
    %cst_33 = arith.constant 1.000000e+00 : f32
    %137 = vector.broadcast %cst_33 : f32 to vector<2x96xf32>
    %138 = arith.addf %137, %136 : vector<2x96xf32>
    %139 = arith.divf %137, %138 : vector<2x96xf32>
    %140 = vector.extract_strided_slice %133 {offsets = [0, 96], sizes = [2, 32], strides = [1, 1]} : vector<2x128xf32> to vector<2x32xf32>
    %141 = math.tanh %140 : vector<2x32xf32>
    %142 = vector.extract_strided_slice %139 {offsets = [0, 0], sizes = [2, 32], strides = [1, 1]} : vector<2x96xf32> to vector<2x32xf32>
    %143 = vector.extract_strided_slice %139 {offsets = [0, 32], sizes = [2, 32], strides = [1, 1]} : vector<2x96xf32> to vector<2x32xf32>
    %144 = vector.extract_strided_slice %139 {offsets = [0, 64], sizes = [2, 32], strides = [1, 1]} : vector<2x96xf32> to vector<2x32xf32>
    %145 = arith.mulf %143, %127 : vector<2x32xf32>
    %146 = arith.mulf %142, %141 : vector<2x32xf32>
    %147 = arith.addf %145, %146 : vector<2x32xf32>
    %148 = math.tanh %147 : vector<2x32xf32>
    %149 = arith.mulf %144, %148 : vector<2x32xf32>
    %c12 = arith.constant 12 : index
    %c0_34 = arith.constant 0 : index
    %150 = vector.load %arg12[%c12, %c0_34] : memref<16x32xf32, #tpu.memory_space<vmem>>, vector<2x32xf32>
    tpu.vector_store %arg12[%c12, %c0_34], %149 {strides = array<i32>} : memref<16x32xf32, #tpu.memory_space<vmem>>, vector<2x32xf32>,
    %151 = vector.extract_strided_slice %6 {offsets = [14, 0], sizes = [2, 128], strides = [1, 1]} : vector<16x128xf32> to vector<2x128xf32>
    %cst_35 = arith.constant dense<0.000000e+00> : vector<2x128xf32>
    %152 = tpu.matmul %149, %1, %cst_35 {dimension_numbers = #tpu.dot_dimension_numbers<[1], [0], [0], [1], [0, 0, 1, 1], [], []>} : vector<2x32xf32>, vector<32x128xf32>, vector<2x128xf32> -> vector<2x128xf32>
    %153 = arith.addf %151, %152 : vector<2x128xf32>
    %154 = vector.extract_strided_slice %153 {offsets = [0, 0], sizes = [2, 96], strides = [1, 1]} : vector<2x128xf32> to vector<2x96xf32>
    %155 = arith.negf %154 : vector<2x96xf32>
    %156 = math.exp %155 : vector<2x96xf32>
    %cst_36 = arith.constant 1.000000e+00 : f32
    %157 = vector.broadcast %cst_36 : f32 to vector<2x96xf32>
    %158 = arith.addf %157, %156 : vector<2x96xf32>
    %159 = arith.divf %157, %158 : vector<2x96xf32>
    %160 = vector.extract_strided_slice %153 {offsets = [0, 96], sizes = [2, 32], strides = [1, 1]} : vector<2x128xf32> to vector<2x32xf32>
    %161 = math.tanh %160 : vector<2x32xf32>
    %162 = vector.extract_strided_slice %159 {offsets = [0, 0], sizes = [2, 32], strides = [1, 1]} : vector<2x96xf32> to vector<2x32xf32>
    %163 = vector.extract_strided_slice %159 {offsets = [0, 32], sizes = [2, 32], strides = [1, 1]} : vector<2x96xf32> to vector<2x32xf32>
    %164 = vector.extract_strided_slice %159 {offsets = [0, 64], sizes = [2, 32], strides = [1, 1]} : vector<2x96xf32> to vector<2x32xf32>
    %165 = arith.mulf %163, %147 : vector<2x32xf32>
    %166 = arith.mulf %162, %161 : vector<2x32xf32>
    %167 = arith.addf %165, %166 : vector<2x32xf32>
    %168 = math.tanh %167 : vector<2x32xf32>
    %169 = arith.mulf %164, %168 : vector<2x32xf32>
    %c14 = arith.constant 14 : index
    %c0_37 = arith.constant 0 : index
    %170 = vector.load %arg12[%c14, %c0_37] : memref<16x32xf32, #tpu.memory_space<vmem>>, vector<2x32xf32>
    tpu.vector_store %arg12[%c14, %c0_37], %169 {strides = array<i32>} : memref<16x32xf32, #tpu.memory_space<vmem>>, vector<2x32xf32>,
    %c0_38 = arith.constant 0 : index
    %c0_39 = arith.constant 0 : index
    %171 = vector.load %arg12[%c0_38, %c0_39] : memref<16x32xf32, #tpu.memory_space<vmem>>, vector<16x32xf32>
    %c0_40 = arith.constant 0 : index
    %c0_41 = arith.constant 0 : index
    %172 = vector.load %arg7[%c0_40, %c0_41] : memref<32x128xf32, #tpu.memory_space<vmem>>, vector<32x128xf32>
    %c0_42 = arith.constant 0 : index
    %c0_43 = arith.constant 0 : index
    %173 = vector.load %arg6[%c0_42, %c0_43] : memref<32x128xf32, #tpu.memory_space<vmem>>, vector<32x128xf32>
    %cst_44 = arith.constant dense<0.000000e+00> : vector<16x128xf32>
    %174 = tpu.matmul %171, %173, %cst_44 {dimension_numbers = #tpu.dot_dimension_numbers<[1], [0], [0], [1], [0, 0, 1, 1], [], []>} : vector<16x32xf32>, vector<32x128xf32>, vector<16x128xf32> -> vector<16x128xf32>
    %c0_45 = arith.constant 0 : index
    %c0_46 = arith.constant 0 : index
    %175 = vector.load %arg8[%c0_45, %c0_46] : memref<1x128xf32, #tpu.memory_space<vmem>>, vector<1x128xf32>
    %176 = vector.broadcast %175 : vector<1x128xf32> to vector<16x128xf32>
    %177 = arith.addf %174, %176 : vector<16x128xf32>
    %c1 = arith.constant 1 : index
    %c0_47 = arith.constant 0 : index
    %c0_48 = arith.constant 0 : index
    %178 = vector.load %arg1[%c1, %c0_47, %c0_48] : memref<2x2x32xf32, #tpu.memory_space<vmem>>, vector<1x2x32xf32>
    %179 = vector.shape_cast %178 : vector<1x2x32xf32> to vector<2x32xf32>
    %c1_49 = arith.constant 1 : index
    %c0_50 = arith.constant 0 : index
    %c0_51 = arith.constant 0 : index
    %180 = vector.load %arg2[%c1_49, %c0_50, %c0_51] : memref<2x2x32xf32, #tpu.memory_space<vmem>>, vector<1x2x32xf32>
    %181 = vector.shape_cast %180 : vector<1x2x32xf32> to vector<2x32xf32>
    %182 = vector.extract_strided_slice %177 {offsets = [0, 0], sizes = [2, 128], strides = [1, 1]} : vector<16x128xf32> to vector<2x128xf32>
    %cst_52 = arith.constant dense<0.000000e+00> : vector<2x128xf32>
    %183 = tpu.matmul %179, %172, %cst_52 {dimension_numbers = #tpu.dot_dimension_numbers<[1], [0], [0], [1], [0, 0, 1, 1], [], []>} : vector<2x32xf32>, vector<32x128xf32>, vector<2x128xf32> -> vector<2x128xf32>
    %184 = arith.addf %182, %183 : vector<2x128xf32>
    %185 = vector.extract_strided_slice %184 {offsets = [0, 0], sizes = [2, 96], strides = [1, 1]} : vector<2x128xf32> to vector<2x96xf32>
    %186 = arith.negf %185 : vector<2x96xf32>
    %187 = math.exp %186 : vector<2x96xf32>
    %cst_53 = arith.constant 1.000000e+00 : f32
    %188 = vector.broadcast %cst_53 : f32 to vector<2x96xf32>
    %189 = arith.addf %188, %187 : vector<2x96xf32>
    %190 = arith.divf %188, %189 : vector<2x96xf32>
    %191 = vector.extract_strided_slice %184 {offsets = [0, 96], sizes = [2, 32], strides = [1, 1]} : vector<2x128xf32> to vector<2x32xf32>
    %192 = math.tanh %191 : vector<2x32xf32>
    %193 = vector.extract_strided_slice %190 {offsets = [0, 0], sizes = [2, 32], strides = [1, 1]} : vector<2x96xf32> to vector<2x32xf32>
    %194 = vector.extract_strided_slice %190 {offsets = [0, 32], sizes = [2, 32], strides = [1, 1]} : vector<2x96xf32> to vector<2x32xf32>
    %195 = vector.extract_strided_slice %190 {offsets = [0, 64], sizes = [2, 32], strides = [1, 1]} : vector<2x96xf32> to vector<2x32xf32>
    %196 = arith.mulf %194, %181 : vector<2x32xf32>
    %197 = arith.mulf %193, %192 : vector<2x32xf32>
    %198 = arith.addf %196, %197 : vector<2x32xf32>
    %199 = math.tanh %198 : vector<2x32xf32>
    %200 = arith.mulf %195, %199 : vector<2x32xf32>
    %201 = vector.extract_strided_slice %177 {offsets = [2, 0], sizes = [2, 128], strides = [1, 1]} : vector<16x128xf32> to vector<2x128xf32>
    %cst_54 = arith.constant dense<0.000000e+00> : vector<2x128xf32>
    %202 = tpu.matmul %200, %172, %cst_54 {dimension_numbers = #tpu.dot_dimension_numbers<[1], [0], [0], [1], [0, 0, 1, 1], [], []>} : vector<2x32xf32>, vector<32x128xf32>, vector<2x128xf32> -> vector<2x128xf32>
    %203 = arith.addf %201, %202 : vector<2x128xf32>
    %204 = vector.extract_strided_slice %203 {offsets = [0, 0], sizes = [2, 96], strides = [1, 1]} : vector<2x128xf32> to vector<2x96xf32>
    %205 = arith.negf %204 : vector<2x96xf32>
    %206 = math.exp %205 : vector<2x96xf32>
    %cst_55 = arith.constant 1.000000e+00 : f32
    %207 = vector.broadcast %cst_55 : f32 to vector<2x96xf32>
    %208 = arith.addf %207, %206 : vector<2x96xf32>
    %209 = arith.divf %207, %208 : vector<2x96xf32>
    %210 = vector.extract_strided_slice %203 {offsets = [0, 96], sizes = [2, 32], strides = [1, 1]} : vector<2x128xf32> to vector<2x32xf32>
    %211 = math.tanh %210 : vector<2x32xf32>
    %212 = vector.extract_strided_slice %209 {offsets = [0, 0], sizes = [2, 32], strides = [1, 1]} : vector<2x96xf32> to vector<2x32xf32>
    %213 = vector.extract_strided_slice %209 {offsets = [0, 32], sizes = [2, 32], strides = [1, 1]} : vector<2x96xf32> to vector<2x32xf32>
    %214 = vector.extract_strided_slice %209 {offsets = [0, 64], sizes = [2, 32], strides = [1, 1]} : vector<2x96xf32> to vector<2x32xf32>
    %215 = arith.mulf %213, %198 : vector<2x32xf32>
    %216 = arith.mulf %212, %211 : vector<2x32xf32>
    %217 = arith.addf %215, %216 : vector<2x32xf32>
    %218 = math.tanh %217 : vector<2x32xf32>
    %219 = arith.mulf %214, %218 : vector<2x32xf32>
    %220 = vector.extract_strided_slice %177 {offsets = [4, 0], sizes = [2, 128], strides = [1, 1]} : vector<16x128xf32> to vector<2x128xf32>
    %cst_56 = arith.constant dense<0.000000e+00> : vector<2x128xf32>
    %221 = tpu.matmul %219, %172, %cst_56 {dimension_numbers = #tpu.dot_dimension_numbers<[1], [0], [0], [1], [0, 0, 1, 1], [], []>} : vector<2x32xf32>, vector<32x128xf32>, vector<2x128xf32> -> vector<2x128xf32>
    %222 = arith.addf %220, %221 : vector<2x128xf32>
    %223 = vector.extract_strided_slice %222 {offsets = [0, 0], sizes = [2, 96], strides = [1, 1]} : vector<2x128xf32> to vector<2x96xf32>
    %224 = arith.negf %223 : vector<2x96xf32>
    %225 = math.exp %224 : vector<2x96xf32>
    %cst_57 = arith.constant 1.000000e+00 : f32
    %226 = vector.broadcast %cst_57 : f32 to vector<2x96xf32>
    %227 = arith.addf %226, %225 : vector<2x96xf32>
    %228 = arith.divf %226, %227 : vector<2x96xf32>
    %229 = vector.extract_strided_slice %222 {offsets = [0, 96], sizes = [2, 32], strides = [1, 1]} : vector<2x128xf32> to vector<2x32xf32>
    %230 = math.tanh %229 : vector<2x32xf32>
    %231 = vector.extract_strided_slice %228 {offsets = [0, 0], sizes = [2, 32], strides = [1, 1]} : vector<2x96xf32> to vector<2x32xf32>
    %232 = vector.extract_strided_slice %228 {offsets = [0, 32], sizes = [2, 32], strides = [1, 1]} : vector<2x96xf32> to vector<2x32xf32>
    %233 = vector.extract_strided_slice %228 {offsets = [0, 64], sizes = [2, 32], strides = [1, 1]} : vector<2x96xf32> to vector<2x32xf32>
    %234 = arith.mulf %232, %217 : vector<2x32xf32>
    %235 = arith.mulf %231, %230 : vector<2x32xf32>
    %236 = arith.addf %234, %235 : vector<2x32xf32>
    %237 = math.tanh %236 : vector<2x32xf32>
    %238 = arith.mulf %233, %237 : vector<2x32xf32>
    %239 = vector.extract_strided_slice %177 {offsets = [6, 0], sizes = [2, 128], strides = [1, 1]} : vector<16x128xf32> to vector<2x128xf32>
    %cst_58 = arith.constant dense<0.000000e+00> : vector<2x128xf32>
    %240 = tpu.matmul %238, %172, %cst_58 {dimension_numbers = #tpu.dot_dimension_numbers<[1], [0], [0], [1], [0, 0, 1, 1], [], []>} : vector<2x32xf32>, vector<32x128xf32>, vector<2x128xf32> -> vector<2x128xf32>
    %241 = arith.addf %239, %240 : vector<2x128xf32>
    %242 = vector.extract_strided_slice %241 {offsets = [0, 0], sizes = [2, 96], strides = [1, 1]} : vector<2x128xf32> to vector<2x96xf32>
    %243 = arith.negf %242 : vector<2x96xf32>
    %244 = math.exp %243 : vector<2x96xf32>
    %cst_59 = arith.constant 1.000000e+00 : f32
    %245 = vector.broadcast %cst_59 : f32 to vector<2x96xf32>
    %246 = arith.addf %245, %244 : vector<2x96xf32>
    %247 = arith.divf %245, %246 : vector<2x96xf32>
    %248 = vector.extract_strided_slice %241 {offsets = [0, 96], sizes = [2, 32], strides = [1, 1]} : vector<2x128xf32> to vector<2x32xf32>
    %249 = math.tanh %248 : vector<2x32xf32>
    %250 = vector.extract_strided_slice %247 {offsets = [0, 0], sizes = [2, 32], strides = [1, 1]} : vector<2x96xf32> to vector<2x32xf32>
    %251 = vector.extract_strided_slice %247 {offsets = [0, 32], sizes = [2, 32], strides = [1, 1]} : vector<2x96xf32> to vector<2x32xf32>
    %252 = vector.extract_strided_slice %247 {offsets = [0, 64], sizes = [2, 32], strides = [1, 1]} : vector<2x96xf32> to vector<2x32xf32>
    %253 = arith.mulf %251, %236 : vector<2x32xf32>
    %254 = arith.mulf %250, %249 : vector<2x32xf32>
    %255 = arith.addf %253, %254 : vector<2x32xf32>
    %256 = math.tanh %255 : vector<2x32xf32>
    %257 = arith.mulf %252, %256 : vector<2x32xf32>
    %258 = vector.extract_strided_slice %177 {offsets = [8, 0], sizes = [2, 128], strides = [1, 1]} : vector<16x128xf32> to vector<2x128xf32>
    %cst_60 = arith.constant dense<0.000000e+00> : vector<2x128xf32>
    %259 = tpu.matmul %257, %172, %cst_60 {dimension_numbers = #tpu.dot_dimension_numbers<[1], [0], [0], [1], [0, 0, 1, 1], [], []>} : vector<2x32xf32>, vector<32x128xf32>, vector<2x128xf32> -> vector<2x128xf32>
    %260 = arith.addf %258, %259 : vector<2x128xf32>
    %261 = vector.extract_strided_slice %260 {offsets = [0, 0], sizes = [2, 96], strides = [1, 1]} : vector<2x128xf32> to vector<2x96xf32>
    %262 = arith.negf %261 : vector<2x96xf32>
    %263 = math.exp %262 : vector<2x96xf32>
    %cst_61 = arith.constant 1.000000e+00 : f32
    %264 = vector.broadcast %cst_61 : f32 to vector<2x96xf32>
    %265 = arith.addf %264, %263 : vector<2x96xf32>
    %266 = arith.divf %264, %265 : vector<2x96xf32>
    %267 = vector.extract_strided_slice %260 {offsets = [0, 96], sizes = [2, 32], strides = [1, 1]} : vector<2x128xf32> to vector<2x32xf32>
    %268 = math.tanh %267 : vector<2x32xf32>
    %269 = vector.extract_strided_slice %266 {offsets = [0, 0], sizes = [2, 32], strides = [1, 1]} : vector<2x96xf32> to vector<2x32xf32>
    %270 = vector.extract_strided_slice %266 {offsets = [0, 32], sizes = [2, 32], strides = [1, 1]} : vector<2x96xf32> to vector<2x32xf32>
    %271 = vector.extract_strided_slice %266 {offsets = [0, 64], sizes = [2, 32], strides = [1, 1]} : vector<2x96xf32> to vector<2x32xf32>
    %272 = arith.mulf %270, %255 : vector<2x32xf32>
    %273 = arith.mulf %269, %268 : vector<2x32xf32>
    %274 = arith.addf %272, %273 : vector<2x32xf32>
    %275 = math.tanh %274 : vector<2x32xf32>
    %276 = arith.mulf %271, %275 : vector<2x32xf32>
    %277 = vector.extract_strided_slice %177 {offsets = [10, 0], sizes = [2, 128], strides = [1, 1]} : vector<16x128xf32> to vector<2x128xf32>
    %cst_62 = arith.constant dense<0.000000e+00> : vector<2x128xf32>
    %278 = tpu.matmul %276, %172, %cst_62 {dimension_numbers = #tpu.dot_dimension_numbers<[1], [0], [0], [1], [0, 0, 1, 1], [], []>} : vector<2x32xf32>, vector<32x128xf32>, vector<2x128xf32> -> vector<2x128xf32>
    %279 = arith.addf %277, %278 : vector<2x128xf32>
    %280 = vector.extract_strided_slice %279 {offsets = [0, 0], sizes = [2, 96], strides = [1, 1]} : vector<2x128xf32> to vector<2x96xf32>
    %281 = arith.negf %280 : vector<2x96xf32>
    %282 = math.exp %281 : vector<2x96xf32>
    %cst_63 = arith.constant 1.000000e+00 : f32
    %283 = vector.broadcast %cst_63 : f32 to vector<2x96xf32>
    %284 = arith.addf %283, %282 : vector<2x96xf32>
    %285 = arith.divf %283, %284 : vector<2x96xf32>
    %286 = vector.extract_strided_slice %279 {offsets = [0, 96], sizes = [2, 32], strides = [1, 1]} : vector<2x128xf32> to vector<2x32xf32>
    %287 = math.tanh %286 : vector<2x32xf32>
    %288 = vector.extract_strided_slice %285 {offsets = [0, 0], sizes = [2, 32], strides = [1, 1]} : vector<2x96xf32> to vector<2x32xf32>
    %289 = vector.extract_strided_slice %285 {offsets = [0, 32], sizes = [2, 32], strides = [1, 1]} : vector<2x96xf32> to vector<2x32xf32>
    %290 = vector.extract_strided_slice %285 {offsets = [0, 64], sizes = [2, 32], strides = [1, 1]} : vector<2x96xf32> to vector<2x32xf32>
    %291 = arith.mulf %289, %274 : vector<2x32xf32>
    %292 = arith.mulf %288, %287 : vector<2x32xf32>
    %293 = arith.addf %291, %292 : vector<2x32xf32>
    %294 = math.tanh %293 : vector<2x32xf32>
    %295 = arith.mulf %290, %294 : vector<2x32xf32>
    %296 = vector.extract_strided_slice %177 {offsets = [12, 0], sizes = [2, 128], strides = [1, 1]} : vector<16x128xf32> to vector<2x128xf32>
    %cst_64 = arith.constant dense<0.000000e+00> : vector<2x128xf32>
    %297 = tpu.matmul %295, %172, %cst_64 {dimension_numbers = #tpu.dot_dimension_numbers<[1], [0], [0], [1], [0, 0, 1, 1], [], []>} : vector<2x32xf32>, vector<32x128xf32>, vector<2x128xf32> -> vector<2x128xf32>
    %298 = arith.addf %296, %297 : vector<2x128xf32>
    %299 = vector.extract_strided_slice %298 {offsets = [0, 0], sizes = [2, 96], strides = [1, 1]} : vector<2x128xf32> to vector<2x96xf32>
    %300 = arith.negf %299 : vector<2x96xf32>
    %301 = math.exp %300 : vector<2x96xf32>
    %cst_65 = arith.constant 1.000000e+00 : f32
    %302 = vector.broadcast %cst_65 : f32 to vector<2x96xf32>
    %303 = arith.addf %302, %301 : vector<2x96xf32>
    %304 = arith.divf %302, %303 : vector<2x96xf32>
    %305 = vector.extract_strided_slice %298 {offsets = [0, 96], sizes = [2, 32], strides = [1, 1]} : vector<2x128xf32> to vector<2x32xf32>
    %306 = math.tanh %305 : vector<2x32xf32>
    %307 = vector.extract_strided_slice %304 {offsets = [0, 0], sizes = [2, 32], strides = [1, 1]} : vector<2x96xf32> to vector<2x32xf32>
    %308 = vector.extract_strided_slice %304 {offsets = [0, 32], sizes = [2, 32], strides = [1, 1]} : vector<2x96xf32> to vector<2x32xf32>
    %309 = vector.extract_strided_slice %304 {offsets = [0, 64], sizes = [2, 32], strides = [1, 1]} : vector<2x96xf32> to vector<2x32xf32>
    %310 = arith.mulf %308, %293 : vector<2x32xf32>
    %311 = arith.mulf %307, %306 : vector<2x32xf32>
    %312 = arith.addf %310, %311 : vector<2x32xf32>
    %313 = math.tanh %312 : vector<2x32xf32>
    %314 = arith.mulf %309, %313 : vector<2x32xf32>
    %315 = vector.extract_strided_slice %177 {offsets = [14, 0], sizes = [2, 128], strides = [1, 1]} : vector<16x128xf32> to vector<2x128xf32>
    %cst_66 = arith.constant dense<0.000000e+00> : vector<2x128xf32>
    %316 = tpu.matmul %314, %172, %cst_66 {dimension_numbers = #tpu.dot_dimension_numbers<[1], [0], [0], [1], [0, 0, 1, 1], [], []>} : vector<2x32xf32>, vector<32x128xf32>, vector<2x128xf32> -> vector<2x128xf32>
    %317 = arith.addf %315, %316 : vector<2x128xf32>
    %318 = vector.extract_strided_slice %317 {offsets = [0, 0], sizes = [2, 96], strides = [1, 1]} : vector<2x128xf32> to vector<2x96xf32>
    %319 = arith.negf %318 : vector<2x96xf32>
    %320 = math.exp %319 : vector<2x96xf32>
    %cst_67 = arith.constant 1.000000e+00 : f32
    %321 = vector.broadcast %cst_67 : f32 to vector<2x96xf32>
    %322 = arith.addf %321, %320 : vector<2x96xf32>
    %323 = arith.divf %321, %322 : vector<2x96xf32>
    %324 = vector.extract_strided_slice %317 {offsets = [0, 96], sizes = [2, 32], strides = [1, 1]} : vector<2x128xf32> to vector<2x32xf32>
    %325 = math.tanh %324 : vector<2x32xf32>
    %326 = vector.extract_strided_slice %323 {offsets = [0, 0], sizes = [2, 32], strides = [1, 1]} : vector<2x96xf32> to vector<2x32xf32>
    %327 = vector.extract_strided_slice %323 {offsets = [0, 32], sizes = [2, 32], strides = [1, 1]} : vector<2x96xf32> to vector<2x32xf32>
    %328 = vector.extract_strided_slice %323 {offsets = [0, 64], sizes = [2, 32], strides = [1, 1]} : vector<2x96xf32> to vector<2x32xf32>
    %329 = arith.mulf %327, %312 : vector<2x32xf32>
    %330 = arith.mulf %326, %325 : vector<2x32xf32>
    %331 = arith.addf %329, %330 : vector<2x32xf32>
    %332 = math.tanh %331 : vector<2x32xf32>
    %333 = arith.mulf %328, %332 : vector<2x32xf32>
    %c0_68 = arith.constant 0 : index
    %c0_69 = arith.constant 0 : index
    %334 = vector.load %arg9[%c0_68, %c0_69] : memref<32x128xf32, #tpu.memory_space<vmem>>, vector<32x128xf32>
    %cst_70 = arith.constant dense<0.000000e+00> : vector<2x128xf32>
    %335 = tpu.matmul %333, %334, %cst_70 {dimension_numbers = #tpu.dot_dimension_numbers<[1], [0], [0], [1], [0, 0, 1, 1], [], []>} : vector<2x32xf32>, vector<32x128xf32>, vector<2x128xf32> -> vector<2x128xf32>
    %c0_71 = arith.constant 0 : index
    %c0_72 = arith.constant 0 : index
    %336 = vector.load %arg10[%c0_71, %c0_72] : memref<1x128xf32, #tpu.memory_space<vmem>>, vector<1x128xf32>
    %337 = vector.broadcast %336 : vector<1x128xf32> to vector<2x128xf32>
    %338 = arith.addf %335, %337 : vector<2x128xf32>
    %c0_73 = arith.constant 0 : index
    %c0_74 = arith.constant 0 : index
    %339 = vector.load %arg11[%c0_73, %c0_74] : memref<2x128xf32, #tpu.memory_space<vmem>>, vector<2x128xf32>
    tpu.vector_store %arg11[%c0_73, %c0_74], %338 {strides = array<i32>} : memref<2x128xf32, #tpu.memory_space<vmem>>, vector<2x128xf32>,
    return
  }
}

</mosaic_0001>

<bundles_post_ra>
// kernel: tpu_custom_call.1
= control target key start
LH: loop header
LB: loop body
LE: loop exit
PB: predicated region body
PF: predicated region fallthrough
CT: control target
= control target key end

     0   :  { %16 = vsyncpa [#allocation4], 0  ;;  %s3275_s0 = inlined_call_operand.vmem [shape: f32[16,4], index: 0, kind: input, shape index: {}]   ;;  %s3276_s1 = inlined_call_operand.hbm [shape: f32[2,2,32], index: 1, kind: input, shape index: {}]   ;;  %s3277_s2 = inlined_call_operand.hbm [shape: f32[2,2,32], index: 2, kind: input, shape index: {}]   ;;  %s3278_s3 = inlined_call_operand.hbm [shape: f32[4,128], index: 3, kind: input, shape index: {}]   ;;  %s3279_s4 = inlined_call_operand.hbm [shape: f32[32,128], index: 4, kind: input, shape index: {}]   ;;  %s3280_s5 = inlined_call_operand.hbm [shape: f32[1,128], index: 5, kind: input, shape index: {}]   ;;  %s3281_s6 = inlined_call_operand.hbm [shape: f32[32,128], index: 6, kind: input, shape index: {}]   ;;  %s3282_s7 = inlined_call_operand.vmem [shape: f32[32,128], index: 7, kind: input, shape index: {}]   ;;  %s3283_s8 = inlined_call_operand.vmem [shape: f32[1,128], index: 8, kind: input, shape index: {}]   ;;  %s3284_s9 = inlined_call_operand.hbm [shape: f32[32,128], index: 9, kind: input, shape index: {}]   ;;  %s3285_s10 = inlined_call_operand.vmem [shape: f32[1,128], index: 10, kind: input, shape index: {}]   ;;  %s3286_s11 = inlined_call_operand.hbm [shape: f32[2,128], index: 11, kind: output, shape index: {}]  }
   0x1   :  { %17 = vsyncpa [#allocation7], 0 }
   0x2   :  { %18 = vsyncpa [#allocation10], 0 }
   0x3   :  { %19 = vsyncpa [#allocation13], 0 }
   0x4   :  { %20 = vsyncpa [#allocation5], 0  ;;  %s2817_s17 = smov [#allocation6]   ;;  %s2818_s19 = smov [#allocation9]  }
   0x5   :  { %s40_s18 = sshll.u32 %s2817_s17, 4  ;;  %s62_s20 = sshll.u32 %s2818_s19, 4  ;;  %s41_s18 = int_to_ptr.vmem [resolvable:$true] %s40_s18  ;;  %s63_s20 = int_to_ptr.vmem [resolvable:$true] %s62_s20 }
   0x6   :  { %s2655_s21 = scalar_lea.vmem %s41_s18, 64  ;;  %p2660_p1 = scmp.lt.s32.totalorder %s41_s18, %s41_s18 }
   0x7   :  { %p2656_p0 = scmp.ne.s32.totalorder %s41_s18, %s2655_s21  ;;  %p2661_p2 = scmp.lt.s32.totalorder %s2655_s21, %s2655_s21 }
   0x9   :  { %p2662_p3 = por %p2661_p2, %p2660_p1 }
   0xb   :  { %p2663_p4 = pnand %p2662_p3, %p2656_p0 }
   0xd   :  { %2666 = shalt.err (!%p2663_p4)
}
   0xe   :  { %s2819_s22 = smov 32   ;;  %s2820_s23 = smov 2  }
   0xf   :  { %46 = dma.hbm_to_vmem [thread:$0]  %s3277_s2, 64, %s41_s18, [#allocation7], %s2819_s22, %s2819_s22, %s2820_s23  }
  0x10   :  { %s2675_s26 = scalar_lea.vmem %s63_s20, 512  ;;  %p2680_p6 = scmp.lt.s32.totalorder %s63_s20, %s63_s20 }
  0x11   :  { %p2676_p5 = scmp.ne.s32.totalorder %s63_s20, %s2675_s26  ;;  %p2681_p7 = scmp.lt.s32.totalorder %s2675_s26, %s2675_s26 }
  0x13   :  { %p2682_p8 = por %p2681_p7, %p2680_p6 }
  0x15   :  { %p2683_p9 = pnand %p2682_p8, %p2676_p5 }
  0x17   :  { %2686 = shalt.err (!%p2683_p9)
}
  0x18   :  { %s2821_s27 = smov 128   ;;  %s2822_s28 = smov 8  }
  0x19   :  { %68 = dma.hbm_to_vmem [thread:$0]  %s3279_s4, 512, %s63_s20, [#allocation10], %s2821_s27, %s2821_s27, %s2822_s28  }
  0x1a   :  { %s2823_s12 = smov [#allocation12]   ;;  %s2824_s14 = smov [#allocation3]  }
  0x1b   :  { %s84_s13 = sshll.u32 %s2823_s12, 4  ;;  %s28_s2 = sshll.u32 %s2824_s14, 4  ;;  %s85_s13 = int_to_ptr.vmem [resolvable:$true] %s84_s13  ;;  %s29_s2 = int_to_ptr.vmem [resolvable:$true] %s28_s2 }
  0x1c   :  { %s2695_s15 = scalar_lea.vmem %s85_s13, 512  ;;  %p2700_p11 = scmp.lt.s32.totalorder %s85_s13, %s85_s13 }
  0x1d   :  { %p2696_p10 = scmp.ne.s32.totalorder %s85_s13, %s2695_s15  ;;  %p2701_p12 = scmp.lt.s32.totalorder %s2695_s15, %s2695_s15 }
  0x1f   :  { %p2702_p13 = por %p2701_p12, %p2700_p11 }
  0x21   :  { %p2703_p0 = pnand %p2702_p13, %p2696_p10 }
  0x23   :  { %2706 = shalt.err (!%p2703_p0)
}
  0x24   :  { %90 = dma.hbm_to_vmem [thread:$0]  %s3281_s6, 512, %s85_s13, [#allocation13], %s2821_s27, %s2821_s27, %s2822_s28  }
  0x25   :  { %s2715_s4 = scalar_lea.vmem %s29_s2, 64  ;;  %p2720_p2 = scmp.lt.s32.totalorder %s29_s2, %s29_s2 }
  0x26   :  { %p2716_p1 = scmp.ne.s32.totalorder %s29_s2, %s2715_s4  ;;  %p2721_p3 = scmp.lt.s32.totalorder %s2715_s4, %s2715_s4 }
  0x28   :  { %p2722_p4 = por %p2721_p3, %p2720_p2 }
  0x2a   :  { %p2723_p5 = pnand %p2722_p4, %p2716_p1 }
  0x2c   :  { %2726 = shalt.err (!%p2723_p5)
}
  0x2d   :  { %34 = dma.hbm_to_vmem [thread:$0]  %s3276_s1, 64, %s29_s2, [#allocation4], %s2819_s22, %s2819_s22, %s2820_s23  }
  0x2e   :  { %s2825_s20 = smov [#allocation8]   ;;  %s2826_s24 = smov [#allocation11]  }
  0x2f   :  { %s53_s21 = sshll.u32 %s2825_s20, 4  ;;  %s75_s25 = sshll.u32 %s2826_s24, 4  ;;  %s54_s21 = int_to_ptr.vmem [resolvable:$true] %s53_s21  ;;  %s76_s25 = int_to_ptr.vmem [resolvable:$true] %s75_s25 }
  0x30   :  { %s2735_s6 = scalar_lea.vmem %s54_s21, 64  ;;  %p2740_p7 = scmp.lt.s32.totalorder %s54_s21, %s54_s21 }
  0x31   :  { %p2736_p6 = scmp.ne.s32.totalorder %s54_s21, %s2735_s6  ;;  %p2741_p8 = scmp.lt.s32.totalorder %s2735_s6, %s2735_s6 }
  0x33   :  { %p2742_p9 = por %p2741_p8, %p2740_p7 }
  0x35   :  { %p2743_p10 = pnand %p2742_p9, %p2736_p6 }
  0x37   :  { %2746 = shalt.err (!%p2743_p10)
}
  0x38   :  { %56 = dma.hbm_to_vmem [thread:$0]  %s3278_s3, 64, %s54_s21, [#allocation7]  }
  0x39   :  { %s2755_s30 = scalar_lea.vmem %s76_s25, 16  ;;  %s2759_s1 = scalar_lea.vmem %s76_s25, 32 }
  0x3a   :  { %p2756_p11 = scmp.ne.s32.totalorder %s76_s25, %s2755_s30  ;;  %p2760_p12 = scmp.lt.s32.totalorder %s76_s25, %s76_s25 }
  0x3b   :  { %p2761_p13 = scmp.lt.s32.totalorder %s2759_s1, %s2755_s30 }
  0x3d   :  { %p2762_p0 = por %p2761_p13, %p2760_p12 }
  0x3f   :  { %p2763_p1 = pnand %p2762_p0, %p2756_p11 }
  0x41   :  { %2766 = shalt.err (!%p2763_p1)
}
  0x42   :  { %78 = dma.hbm_to_vmem [thread:$0]  %s3280_s5, 16, %s76_s25, [#allocation10]  }
  0x43   :  { %s2827_s13 = smov [#allocation14]  }
  0x44   :  { %s100_s14 = sshll.u32 %s2827_s13, 4  ;;  %s101_s14 = int_to_ptr.vmem [resolvable:$true] %s100_s14 }
  0x45   :  { %s2775_s2 = scalar_lea.vmem %s101_s14, 512  ;;  %p2780_p3 = scmp.lt.s32.totalorder %s101_s14, %s101_s14 }
  0x46   :  { %p2776_p2 = scmp.ne.s32.totalorder %s101_s14, %s2775_s2  ;;  %p2781_p4 = scmp.lt.s32.totalorder %s2775_s2, %s2775_s2 }
  0x48   :  { %p2782_p5 = por %p2781_p4, %p2780_p3 }
  0x4a   :  { %p2783_p6 = pnand %p2782_p5, %p2776_p2 }
  0x4c   :  { %2786 = shalt.err (!%p2783_p6)
}
  0x4d   :  { %106 = dma.hbm_to_vmem [thread:$0]  %s3284_s9, 512, %s101_s14, [#allocation13], %s2821_s27, %s2821_s27, %s2822_s28  }
  0x4e   :  { %2807 = dma.done.wait [#allocation4], 64  }
  0x4f   :  { %2808 = vsyncadd [#allocation4], 4294967232 }
  0x50   :  { %2809 = dma.done.wait [#allocation7], 128  }
  0x51   :  { %2810 = vsyncadd [#allocation7], 4294967168 }
  0x52   :  { %2811 = dma.done.wait [#allocation10], 528  }
  0x53   :  { %2812 = vsyncadd [#allocation10], 4294966768 }
  0x54   :  { %2813 = dma.done.wait [#allocation13], 1024  }
  0x55   :  { %2814 = vsyncadd [#allocation13], 4294966272  ;;  %v2828_v0 = vmov 0.0   ;;  %vm2829_vm0 = vmmov 0   ;;  %vm151_vm1 = vcmask 1043456   ;;  %vm144_vm2 = vcmask 31744  }
  0x56   :  { %2306 = vmatprep.subr.mxu1 %v2828_v0  ;;  %2314 = vmatprep.mubr.msk.f32.mxu1 %vm2829_vm0, %v2828_v0  ;;  %v136_v1 = vld [vmem:[#allocation8] sm:$0xf]  ;;  %v130_v3 = vld [vmem:[%s3275_s0] sm:$0xff]  ;;  %v131_v4 = vld [vmem:[%s3275_s0 + $0x8] sm:$0xff]  ;;  %vm232_vm3 = vcmask 261120   ;;  %s2830_s0 = smov 64  }
  0x57   :  { %v2931_v2 = vld [vmem:[#allocation9 + $0x18] sm:$0xff]  ;;  %2301 = vmatprep.subr.msk.mxu0 %vm151_vm1, %v136_v1  ;;  %v2940_v5 = vld [vmem:[#allocation9 + $0x10] sm:$0xff]  ;;  %2303 = vmatprep.mubr.msk.f32.mxu0 %vm144_vm2, %v130_v3  ;;  %v2943_v6 = vld [vmem:[#allocation9 + $0x8] sm:$0xff]  ;;  %vm339_vm4 = vcmask 254976   ;;  %vm448_vm5 = vcmask 257026   ;;  %vm672_vm6 = vcmask 261126  }
  0x58   :  { %2307 = vmatpush3.msra.mxu1 %v2931_v2  ;;  %2302 = vmatpush3.msk.msra.mxu0 %vm151_vm1, %v136_v1  ;;  %v2948_v7 = vld [vmem:[#allocation9] sm:$0xff]  ;;  %v230_v8 = vld [vmem:[#allocation3] sm:$0x3]  ;;  %v231_v18 = vld [vmem:[#allocation6] sm:$0x3]  ;;  %vm560_vm7 = vcmask 259076  }
  0x59   :  { %2308 = vmatprep.subr.mxu1 %v2828_v0  ;;  %2304 = vmatmul.mubr.msk.f32.vlgmr.msra.gmra.mxu0 %vm144_vm2, %v131_v4  ;;  %v2166_v9 = vld [vmem:[#allocation11] ss:$0 sm:$0xff]  ;;  %s2831_s26 = smov [#allocation15]  }
  0x5a   :  { %2309 = vmatpush3.msra.mxu1 %v2940_v5  ;;  %2317 = vmatprep.subr.mxu0 %v2828_v0  ;;  %s2154_s29 = sshll.u32 %s2831_s26, 4  ;;  %s2155_s29 = int_to_ptr.vmem [resolvable:$true] %s2154_s29 }
  0x5b   :  { %2310 = vmatprep.subr.mxu1 %v2828_v0  ;;  %2318 = vmatpush3.msra.mxu0 %v2931_v2  ;;  %p2792_p8 = scmp.lt.s32.totalorder %s2155_s29, %s2155_s29 }
  0x5c   :  { %2311 = vmatpush3.msra.mxu1 %v2943_v6  ;;  %2319 = vmatprep.subr.mxu0 %v2828_v0 }
  0x5d   :  { %2312 = vmatprep.subr.mxu1 %v2828_v0  ;;  %2320 = vmatpush3.msra.mxu0 %v2940_v5 }
  0x5e   :  { %2313 = vmatpush3.msra.mxu1 %v2948_v7  ;;  %2321 = vmatprep.subr.mxu0 %v2828_v0 }
  0x5f   :  { %2315 = vmatmul.mubr.msk.f32.vlgmr.msra.gmra.mxu1 %vm232_vm3, %v230_v8  ;;  %2322 = vmatpush3.msra.mxu0 %v2943_v6 }
  0x60   :  { %2323 = vmatprep.subr.mxu0 %v2828_v0  ;;  %2325 = vmatprep.mubr.msk.f32.mxu0 %vm2829_vm0, %v2828_v0 }
  0x61   :  { %2324 = vmatpush3.msra.mxu0 %v2948_v7  ;;  %2328 = vmatprep.subr.mxu1 %v2828_v0 }
  0x62   :  { %2329 = vmatpush3.msra.mxu1 %v2931_v2  ;;  %2336 = vmatprep.mubr.msk.f32.mxu1 %vm2829_vm0, %v2828_v0 }
  0x63   :  { %2330 = vmatprep.subr.mxu1 %v2828_v0  ;;  %2339 = vmatprep.subr.mxu0 %v2828_v0 }
  0x64   :  { %2331 = vmatpush3.msra.mxu1 %v2940_v5 }
  0x65   :  { %2332 = vmatprep.subr.mxu1 %v2828_v0 }
  0x66   :  { %2333 = vmatpush3.msra.mxu1 %v2943_v6 }
  0x67   :  { %2334 = vmatprep.subr.mxu1 %v2828_v0 }
  0x68   :  { %2335 = vmatpush3.msra.mxu1 %v2948_v7 }
  0x69   :  { %2350 = vmatprep.subr.mxu1 %v2828_v0 }
 0x119   :  { %v2305_v10 = vpop.f32.mrf.mxu0 }
 0x11a   :  { %v2975_v11 = vadd.f32 %v2305_v10, %v2166_v9 }
 0x11b   :  { %v221_v12 = vpop.f32.mrf.mxu0 }
 0x11c   :  { %v2977_v13 = vadd.f32 %v2166_v9, %v221_v12 }
 0x11f   :  { %v302_v14 = vpop.f32.mrf.mxu1 }
 0x120   :  { %v306_v15 = vadd.f32 %v302_v14, %v2977_v13 }
 0x121   :  { %v2316_v16 = vpop.f32.mrf.mxu1 }
 0x122   :  { %2519 = vtanh.f32 %v306_v15  ;;  %v2171_v19 = vmul.f32 -1.442695, %v306_v15 }
 0x124   :  { %2521 = vpow2.f32 %v2171_v19 }
 0x12f   :  { %v2520_v17 = vpop.eup %2519 }
 0x130   :  { %320 = vrot.lane.b32.xlu0 %v2520_v17, %s2819_s22 }
 0x131   :  { %v2522_v20 = vpop.eup %2521 }
 0x132   :  { %v310_v21 = vadd.f32 1.0, %v2522_v20 }
 0x134   :  { %315 = vrot.lane.b32.xlu0 %v231_v18, %s2819_s22  ;;  %2523 = vrcp.f32 %v310_v21 }
 0x141   :  { %v2524_v22 = vpop.eup %2523 }
 0x1a2   :  { %v321_v23 = vpop.permute.xlu0 %320 }
 0x1a3   :  { %v323_v24 = vmul.f32 %v2524_v22, %v321_v23 }
 0x1a5   :  { %325 = vrot.lane.b32.xlu1 %v323_v24, %s2819_s22 }
 0x1a6   :  { %v316_v25 = vpop.permute.xlu0 %315 }
 0x1a7   :  { %v318_v26 = vmul.f32 %v2524_v22, %v316_v25 }
 0x217   :  { %v326_v27 = vpop.permute.xlu1 %325 }
 0x218   :  { %v328_v28 = vadd.f32 %v326_v27, %v318_v26 }
 0x21a   :  { %2525 = vtanh.f32 %v328_v28  ;;  %v425_v44 = vrot.slane %v328_v28, 6 }
 0x227   :  { %v2526_v29 = vpop.eup %2525 }
 0x228   :  { %331 = vrot.lane.b32.xlu1 %v2526_v29, %s2819_s22 }
 0x29a   :  { %v332_v30 = vpop.permute.xlu1 %331 }
 0x29b   :  { %v334_v31 = vmul.f32 %v2524_v22, %v332_v30 }
 0x29d   :  { %336 = vrot.lane.b32.xlu0 %v334_v31, %s2830_s0 }
 0x30f   :  { %v337_v32 = vpop.permute.xlu0 %336 }
 0x310   :  { %340 = vst.msk [vmem:[#allocation2] sm:$0x3] %vm339_vm4, %v337_v32  ;;  %2326 = vmatmul.mubr.msk.f32.vlgmr.msra.gmra.mxu0 %vm232_vm3, %v337_v32 }
 0x311   :  { %2340 = vmatpush3.msra.mxu0 %v2931_v2  ;;  %2347 = vmatprep.mubr.msk.f32.mxu0 %vm2829_vm0, %v2828_v0 }
 0x312   :  { %2341 = vmatprep.subr.mxu0 %v2828_v0 }
 0x313   :  { %2342 = vmatpush3.msra.mxu0 %v2940_v5 }
 0x314   :  { %2343 = vmatprep.subr.mxu0 %v2828_v0 }
 0x315   :  { %2344 = vmatpush3.msra.mxu0 %v2943_v6 }
 0x316   :  { %2345 = vmatprep.subr.mxu0 %v2828_v0 }
 0x317   :  { %2346 = vmatpush3.msra.mxu0 %v2948_v7 }
 0x318   :  { %2361 = vmatprep.subr.mxu0 %v2828_v0 }
 0x3d0   :  { %v409_v33 = vpop.f32.mrf.mxu0 }
 0x3d1   :  { %v414_v34 = vrot.slane %v409_v33, 6 }
 0x3d2   :  { %v2327_v35 = vpop.f32.mrf.mxu0 }
 0x3d3   :  { %v416_v36 = vadd.f32 %v414_v34, %v2977_v13 }
 0x3d5   :  { %2527 = vtanh.f32 %v416_v36  ;;  %v2173_v38 = vmul.f32 -1.442695, %v416_v36 }
 0x3d7   :  { %2529 = vpow2.f32 %v2173_v38 }
 0x3e2   :  { %v2528_v37 = vpop.eup %2527 }
 0x3e3   :  { %429 = vrot.lane.b32.xlu1 %v2528_v37, %s2819_s22 }
 0x3e4   :  { %v2530_v39 = vpop.eup %2529 }
 0x3e5   :  { %v420_v40 = vadd.f32 1.0, %v2530_v39 }
 0x3e7   :  { %2531 = vrcp.f32 %v420_v40 }
 0x3f4   :  { %v2532_v41 = vpop.eup %2531 }
 0x3f5   :  { %v427_v45 = vmul.f32 %v2532_v41, %v425_v44 }
 0x455   :  { %v430_v42 = vpop.permute.xlu1 %429 }
 0x456   :  { %v432_v43 = vmul.f32 %v2532_v41, %v430_v42 }
 0x458   :  { %434 = vrot.lane.b32.xlu0 %v432_v43, %s2819_s22 }
 0x4ca   :  { %v435_v46 = vpop.permute.xlu0 %434 }
 0x4cb   :  { %v437_v47 = vadd.f32 %v435_v46, %v427_v45 }
 0x4cd   :  { %2533 = vtanh.f32 %v437_v47  ;;  %v537_v1 = vrot.slane %v437_v47, 6 }
 0x4da   :  { %v2534_v48 = vpop.eup %2533 }
 0x4db   :  { %440 = vrot.lane.b32.xlu1 %v2534_v48, %s2819_s22 }
 0x54d   :  { %v441_v49 = vpop.permute.xlu1 %440 }
 0x54e   :  { %v3001_v50 = vmul.f32 %v2532_v41, %v441_v49 }
 0x550   :  { %v450_v51 = vrot.slane %v3001_v50, 2 }
 0x552   :  { %451 = vrot.lane.b32.xlu0 %v450_v51, %s2830_s0 }
 0x5c4   :  { %v452_v52 = vpop.permute.xlu0 %451 }
 0x5c5   :  { %2337 = vmatmul.mubr.msk.f32.vlgmr.msra.gmra.mxu1 %vm232_vm3, %v452_v52 }
 0x5c6   :  { %2351 = vmatpush3.msra.mxu1 %v2931_v2  ;;  %2358 = vmatprep.mubr.msk.f32.mxu1 %vm2829_vm0, %v2828_v0 }
 0x5c7   :  { %2352 = vmatprep.subr.mxu1 %v2828_v0 }
 0x5c8   :  { %2353 = vmatpush3.msra.mxu1 %v2940_v5 }
 0x5c9   :  { %2354 = vmatprep.subr.mxu1 %v2828_v0 }
 0x5ca   :  { %2355 = vmatpush3.msra.mxu1 %v2943_v6 }
 0x5cb   :  { %2356 = vmatprep.subr.mxu1 %v2828_v0 }
 0x5cc   :  { %2357 = vmatpush3.msra.mxu1 %v2948_v7 }
 0x5cd   :  { %2372 = vmatprep.subr.mxu1 %v2828_v0 }
 0x685   :  { %v521_v53 = vpop.f32.mrf.mxu1 }
 0x686   :  { %v526_v54 = vrot.slane %v521_v53, 4 }
 0x687   :  { %v2338_v55 = vpop.f32.mrf.mxu1 }
 0x688   :  { %v528_v56 = vadd.f32 %v526_v54, %v2977_v13 }
 0x68a   :  { %2535 = vtanh.f32 %v528_v56  ;;  %v2175_v58 = vmul.f32 -1.442695, %v528_v56 }
 0x68c   :  { %2537 = vpow2.f32 %v2175_v58 }
 0x697   :  { %v2536_v57 = vpop.eup %2535 }
 0x698   :  { %541 = vrot.lane.b32.xlu1 %v2536_v57, %s2819_s22 }
 0x699   :  { %v2538_v59 = vpop.eup %2537 }
 0x69a   :  { %v532_v60 = vadd.f32 1.0, %v2538_v59 }
 0x69c   :  { %2539 = vrcp.f32 %v532_v60 }
 0x6a9   :  { %v2540_v61 = vpop.eup %2539 }
 0x6aa   :  { %v539_v3 = vmul.f32 %v2540_v61, %v537_v1 }
 0x70a   :  { %v542_v62 = vpop.permute.xlu1 %541 }
 0x70b   :  { %v544_v63 = vmul.f32 %v2540_v61, %v542_v62 }
 0x70d   :  { %546 = vrot.lane.b32.xlu0 %v544_v63, %s2819_s22 }
 0x77f   :  { %v547_v4 = vpop.permute.xlu0 %546 }
 0x780   :  { %v549_v8 = vadd.f32 %v547_v4, %v539_v3 }
 0x782   :  { %2541 = vtanh.f32 %v549_v8  ;;  %v649_v27 = vrot.slane %v549_v8, 6 }
 0x78f   :  { %v2542_v9 = vpop.eup %2541 }
 0x790   :  { %552 = vrot.lane.b32.xlu1 %v2542_v9, %s2819_s22 }
 0x802   :  { %v553_v10 = vpop.permute.xlu1 %552 }
 0x803   :  { %v3020_v12 = vmul.f32 %v2540_v61, %v553_v10 }
 0x805   :  { %v562_v14 = vrot.slane %v3020_v12, 4 }
 0x807   :  { %563 = vrot.lane.b32.xlu0 %v562_v14, %s2830_s0 }
 0x879   :  { %v564_v15 = vpop.permute.xlu0 %563 }
 0x87a   :  { %2348 = vmatmul.mubr.msk.f32.vlgmr.msra.gmra.mxu0 %vm232_vm3, %v564_v15 }
 0x87b   :  { %2362 = vmatpush3.msra.mxu0 %v2931_v2  ;;  %2369 = vmatprep.mubr.msk.f32.mxu0 %vm2829_vm0, %v2828_v0 }
 0x87c   :  { %2363 = vmatprep.subr.mxu0 %v2828_v0 }
 0x87d   :  { %2364 = vmatpush3.msra.mxu0 %v2940_v5 }
 0x87e   :  { %2365 = vmatprep.subr.mxu0 %v2828_v0 }
 0x87f   :  { %2366 = vmatpush3.msra.mxu0 %v2943_v6 }
 0x880   :  { %2367 = vmatprep.subr.mxu0 %v2828_v0 }
 0x881   :  { %2368 = vmatpush3.msra.mxu0 %v2948_v7 }
 0x882   :  { %2383 = vmatprep.subr.mxu0 %v2828_v0 }
 0x93a   :  { %v633_v16 = vpop.f32.mrf.mxu0 }
 0x93b   :  { %v638_v17 = vrot.slane %v633_v16, 2 }
 0x93c   :  { %v2349_v18 = vpop.f32.mrf.mxu0 }
 0x93d   :  { %v640_v19 = vadd.f32 %v638_v17, %v2977_v13 }
 0x93f   :  { %2543 = vtanh.f32 %v640_v19  ;;  %v2177_v21 = vmul.f32 -1.442695, %v640_v19 }
 0x941   :  { %2545 = vpow2.f32 %v2177_v21 }
 0x94c   :  { %v2544_v20 = vpop.eup %2543 }
 0x94d   :  { %653 = vrot.lane.b32.xlu1 %v2544_v20, %s2819_s22 }
 0x94e   :  { %v2546_v22 = vpop.eup %2545 }
 0x94f   :  { %v644_v23 = vadd.f32 1.0, %v2546_v22 }
 0x951   :  { %2547 = vrcp.f32 %v644_v23 }
 0x95e   :  { %v2548_v24 = vpop.eup %2547 }
 0x95f   :  { %v651_v28 = vmul.f32 %v2548_v24, %v649_v27 }
 0x9bf   :  { %v654_v25 = vpop.permute.xlu1 %653 }
 0x9c0   :  { %v656_v26 = vmul.f32 %v2548_v24, %v654_v25 }
 0x9c2   :  { %658 = vrot.lane.b32.xlu0 %v656_v26, %s2819_s22 }
 0xa34   :  { %v659_v29 = vpop.permute.xlu0 %658 }
 0xa35   :  { %v661_v30 = vadd.f32 %v659_v29, %v651_v28 }
 0xa37   :  { %2549 = vtanh.f32 %v661_v30  ;;  %v758_v45 = vrot.slane %v661_v30, 6 }
 0xa44   :  { %v2550_v13 = vpop.eup %2549 }
 0xa45   :  { %664 = vrot.lane.b32.xlu1 %v2550_v13, %s2819_s22 }
 0xab7   :  { %v665_v31 = vpop.permute.xlu1 %664 }
 0xab8   :  { %v3039_v32 = vmul.f32 %v2548_v24, %v665_v31 }
 0xaba   :  { %v674_v33 = vrot.slane %v3039_v32, 6 }
 0xabc   :  { %675 = vrot.lane.b32.xlu0 %v674_v33, %s2830_s0 }
 0xb2e   :  { %v676_v34 = vpop.permute.xlu0 %675 }
 0xb2f   :  { %2359 = vmatmul.mubr.msk.f32.vlgmr.msra.gmra.mxu1 %vm232_vm3, %v676_v34 }
 0xb30   :  { %2373 = vmatpush3.msra.mxu1 %v2931_v2  ;;  %2380 = vmatprep.mubr.msk.f32.mxu1 %vm2829_vm0, %v2828_v0 }
 0xb31   :  { %2374 = vmatprep.subr.mxu1 %v2828_v0 }
 0xb32   :  { %2375 = vmatpush3.msra.mxu1 %v2940_v5 }
 0xb33   :  { %2376 = vmatprep.subr.mxu1 %v2828_v0 }
 0xb34   :  { %2377 = vmatpush3.msra.mxu1 %v2943_v6 }
 0xb35   :  { %2378 = vmatprep.subr.mxu1 %v2828_v0 }
 0xb36   :  { %2379 = vmatpush3.msra.mxu1 %v2948_v7 }
 0xbef   :  { %v745_v35 = vpop.f32.mrf.mxu1 }
 0xbf0   :  { %v749_v36 = vadd.f32 %v745_v35, %v2975_v11 }
 0xbf1   :  { %v2360_v37 = vpop.f32.mrf.mxu1 }
 0xbf2   :  { %2551 = vtanh.f32 %v749_v36  ;;  %v2179_v39 = vmul.f32 -1.442695, %v749_v36 }
 0xbf4   :  { %2553 = vpow2.f32 %v2179_v39 }
 0xbff   :  { %v2552_v38 = vpop.eup %2551 }
 0xc00   :  { %762 = vrot.lane.b32.xlu1 %v2552_v38, %s2819_s22 }
 0xc01   :  { %v2554_v40 = vpop.eup %2553 }
 0xc02   :  { %v753_v41 = vadd.f32 1.0, %v2554_v40 }
 0xc04   :  { %2555 = vrcp.f32 %v753_v41 }
 0xc11   :  { %v2556_v42 = vpop.eup %2555 }
 0xc12   :  { %v760_v46 = vmul.f32 %v2556_v42, %v758_v45 }
 0xc72   :  { %v763_v43 = vpop.permute.xlu1 %762 }
 0xc73   :  { %v765_v44 = vmul.f32 %v2556_v42, %v763_v43 }
 0xc75   :  { %767 = vrot.lane.b32.xlu0 %v765_v44, %s2819_s22 }
 0xce7   :  { %v768_v47 = vpop.permute.xlu0 %767 }
 0xce8   :  { %v770_v48 = vadd.f32 %v768_v47, %v760_v46 }
 0xcea   :  { %2557 = vtanh.f32 %v770_v48 }
 0xcf7   :  { %v2558_v49 = vpop.eup %2557 }
 0xcf8   :  { %773 = vrot.lane.b32.xlu1 %v2558_v49, %s2819_s22 }
 0xd6a   :  { %v774_v51 = vpop.permute.xlu1 %773 }
 0xd6b   :  { %v776_v52 = vmul.f32 %v2556_v42, %v774_v51  ;;  %v1121_v51 = vld [vmem:[#allocation12 + $0x18] sm:$0xff] }
 0xd6c   :  { %2394 = vmatprep.subr.mxu1 %v1121_v51 }
 0xd6d   :  { %778 = vrot.lane.b32.xlu0 %v776_v52, %s2830_s0  ;;  %v1120_v52 = vld [vmem:[#allocation12 + $0x10] sm:$0xff] }
 0xddf   :  { %v779_v53 = vpop.permute.xlu0 %778 }
 0xde0   :  { %781 = vst.msk [vmem:[#allocation2 + $0x8] sm:$0x3] %vm339_vm4, %v779_v53  ;;  %2370 = vmatmul.mubr.msk.f32.vlgmr.msra.gmra.mxu0 %vm232_vm3, %v779_v53  ;;  %v3106_v53 = vld [vmem:[%s3282_s7 + $0x18] sm:$0xff] }
 0xde1   :  { %2384 = vmatpush3.msra.mxu0 %v2931_v2  ;;  %2391 = vmatprep.mubr.msk.f32.mxu0 %vm2829_vm0, %v2828_v0 }
 0xde2   :  { %2385 = vmatprep.subr.mxu0 %v2828_v0 }
 0xde3   :  { %2386 = vmatpush3.msra.mxu0 %v2940_v5 }
 0xde4   :  { %2387 = vmatprep.subr.mxu0 %v2828_v0 }
 0xde5   :  { %2388 = vmatpush3.msra.mxu0 %v2943_v6 }
 0xde6   :  { %2389 = vmatprep.subr.mxu0 %v2828_v0 }
 0xde7   :  { %2390 = vmatpush3.msra.mxu0 %v2948_v7  ;;  %v866_v7 = vrot.slane %v770_v48, 6 }
 0xde8   :  { %2405 = vmatprep.subr.mxu0 %v2828_v0 }
 0xea0   :  { %v850_v54 = vpop.f32.mrf.mxu0 }
 0xea1   :  { %v855_v55 = vrot.slane %v850_v54, 6  ;;  %v1119_v54 = vld [vmem:[#allocation12 + $0x8] sm:$0xff] }
 0xea2   :  { %v2371_v2 = vpop.f32.mrf.mxu0 }
 0xea3   :  { %v857_v56 = vadd.f32 %v855_v55, %v2975_v11  ;;  %v3112_v55 = vld [vmem:[%s3282_s7 + $0x10] sm:$0xff]  ;;  %v1118_v2 = vld [vmem:[#allocation12] sm:$0xff] }
 0xea5   :  { %2559 = vtanh.f32 %v857_v56  ;;  %v2181_v5 = vmul.f32 -1.442695, %v857_v56  ;;  %v3127_v56 = vld [vmem:[%s3282_s7] sm:$0xff] }
 0xea7   :  { %2561 = vpow2.f32 %v2181_v5 }
 0xeb2   :  { %v2560_v57 = vpop.eup %2559 }
 0xeb3   :  { %870 = vrot.lane.b32.xlu1 %v2560_v57, %s2819_s22  ;;  %v1211_v57 = vld [vmem:[#allocation3 + $0x2] sm:$0x3] }
 0xeb4   :  { %v2562_v58 = vpop.eup %2561 }
 0xeb5   :  { %v861_v59 = vadd.f32 1.0, %v2562_v58 }
 0xeb7   :  { %2563 = vrcp.f32 %v861_v59 }
 0xec4   :  { %v2564_v6 = vpop.eup %2563 }
 0xec5   :  { %v868_v62 = vmul.f32 %v2564_v6, %v866_v7 }
 0xf25   :  { %v871_v60 = vpop.permute.xlu1 %870 }
 0xf26   :  { %v873_v61 = vmul.f32 %v2564_v6, %v871_v60 }
 0xf28   :  { %875 = vrot.lane.b32.xlu0 %v873_v61, %s2819_s22 }
 0xf9a   :  { %v876_v63 = vpop.permute.xlu0 %875 }
 0xf9b   :  { %v878_v1 = vadd.f32 %v876_v63, %v868_v62 }
 0xf9d   :  { %2565 = vtanh.f32 %v878_v1  ;;  %v977_v25 = vrot.slane %v878_v1, 6 }
 0xfaa   :  { %v2566_v3 = vpop.eup %2565 }
 0xfab   :  { %881 = vrot.lane.b32.xlu1 %v2566_v3, %s2819_s22  ;;  %v2186_v3 = vld [vmem:[%s3283_s8] ss:$0 sm:$0xff] }
0x101d   :  { %v882_v4 = vpop.permute.xlu1 %881 }
0x101e   :  { %v3074_v8 = vmul.f32 %v2564_v6, %v882_v4  ;;  %v1213_v6 = vld [vmem:[#allocation6 + $0x2] sm:$0x3] }
0x1020   :  { %v890_v9 = vrot.slane %v3074_v8, 2 }
0x1022   :  { %891 = vrot.lane.b32.xlu0 %v890_v9, %s2830_s0 }
0x1094   :  { %v892_v10 = vpop.permute.xlu0 %891 }
0x1095   :  { %2381 = vmatmul.mubr.msk.f32.vlgmr.msra.gmra.mxu1 %vm232_vm3, %v892_v10 }
0x1096   :  { %2395 = vmatpush3.msra.mxu1 %v1121_v51 }
0x1097   :  { %2396 = vmatprep.subr.mxu1 %v1120_v52 }
0x1098   :  { %2397 = vmatpush3.msra.mxu1 %v1120_v52 }
0x1099   :  { %2398 = vmatprep.subr.mxu1 %v1119_v54 }
0x109a   :  { %2399 = vmatpush3.msra.mxu1 %v1119_v54 }
0x109b   :  { %2400 = vmatprep.subr.mxu1 %v1118_v2 }
0x109c   :  { %2401 = vmatpush3.msra.mxu1 %v1118_v2 }
0x109d   :  { %2416 = vmatprep.subr.mxu1 %v2828_v0 }
0x1155   :  { %v961_v14 = vpop.f32.mrf.mxu1 }
0x1156   :  { %v966_v15 = vrot.slane %v961_v14, 4 }
0x1157   :  { %v2382_v16 = vpop.f32.mrf.mxu1 }
0x1158   :  { %v968_v17 = vadd.f32 %v966_v15, %v2975_v11 }
0x115a   :  { %2567 = vtanh.f32 %v968_v17  ;;  %v2183_v19 = vmul.f32 -1.442695, %v968_v17 }
0x115c   :  { %2569 = vpow2.f32 %v2183_v19 }
0x1167   :  { %v2568_v18 = vpop.eup %2567 }
0x1168   :  { %981 = vrot.lane.b32.xlu1 %v2568_v18, %s2819_s22 }
0x1169   :  { %v2570_v20 = vpop.eup %2569 }
0x116a   :  { %v972_v21 = vadd.f32 1.0, %v2570_v20 }
0x116c   :  { %2571 = vrcp.f32 %v972_v21 }
0x1179   :  { %v2572_v22 = vpop.eup %2571 }
0x117a   :  { %v979_v26 = vmul.f32 %v2572_v22, %v977_v25 }
0x11da   :  { %v982_v23 = vpop.permute.xlu1 %981 }
0x11db   :  { %v984_v24 = vmul.f32 %v2572_v22, %v982_v23 }
0x11dd   :  { %986 = vrot.lane.b32.xlu0 %v984_v24, %s2819_s22 }
0x124f   :  { %v987_v27 = vpop.permute.xlu0 %986 }
0x1250   :  { %v989_v28 = vadd.f32 %v987_v27, %v979_v26 }
0x1252   :  { %2573 = vtanh.f32 %v989_v28 }
0x125f   :  { %v2574_v29 = vpop.eup %2573 }
0x1260   :  { %992 = vrot.lane.b32.xlu1 %v2574_v29, %s2819_s22 }
0x12d2   :  { %v993_v30 = vpop.permute.xlu1 %992 }
0x12d3   :  { %v995_v13 = vmul.f32 %v2572_v22, %v993_v30 }
0x12d5   :  { %v1001_v31 = vrot.slane %v995_v13, 4 }
0x12d7   :  { %1002 = vrot.lane.b32.xlu0 %v1001_v31, %s2830_s0 }
0x1349   :  { %v1003_v33 = vpop.permute.xlu0 %1002 }
0x134a   :  { %2392 = vmatmul.mubr.msk.f32.vlgmr.msra.gmra.mxu0 %vm232_vm3, %v1003_v33 }
0x134b   :  { %2413 = vmatprep.mubr.msk.f32.mxu0 %vm2829_vm0, %v2828_v0  ;;  %2406 = vmatpush3.msra.mxu0 %v3106_v53 }
0x134c   :  { %2407 = vmatprep.subr.mxu0 %v2828_v0 }
0x134d   :  { %2408 = vmatpush3.msra.mxu0 %v3112_v55 }
0x134e   :  { %2409 = vmatprep.subr.mxu0 %v2828_v0 }
0x140a   :  { %v1072_v34 = vpop.f32.mrf.mxu0 }
0x140b   :  { %v1077_v35 = vrot.slane %v1072_v34, 2 }
0x140c   :  { %v2393_v36 = vpop.f32.mrf.mxu0 }
0x140d   :  { %v1079_v37 = vadd.f32 %v1077_v35, %v2975_v11  ;;  %v1088_v11 = vrot.slane %v989_v28, 6 }
0x140f   :  { %2575 = vtanh.f32 %v1079_v37  ;;  %v2185_v39 = vmul.f32 -1.442695, %v1079_v37 }
0x1411   :  { %2577 = vpow2.f32 %v2185_v39 }
0x141c   :  { %v2576_v38 = vpop.eup %2575 }
0x141d   :  { %1092 = vrot.lane.b32.xlu1 %v2576_v38, %s2819_s22 }
0x141e   :  { %v2578_v40 = vpop.eup %2577 }
0x141f   :  { %v1083_v41 = vadd.f32 1.0, %v2578_v40 }
0x1421   :  { %2579 = vrcp.f32 %v1083_v41 }
0x142e   :  { %v2580_v42 = vpop.eup %2579 }
0x142f   :  { %v1090_v45 = vmul.f32 %v2580_v42, %v1088_v11 }
0x148f   :  { %v1093_v43 = vpop.permute.xlu1 %1092 }
0x1490   :  { %v1095_v44 = vmul.f32 %v2580_v42, %v1093_v43 }
0x1492   :  { %1097 = vrot.lane.b32.xlu0 %v1095_v44, %s2819_s22 }
0x1496   :  { %445 = vrot.lane.b32.xlu0 %v3001_v50, %s2830_s0 }
0x149a   :  { %669 = vrot.lane.b32.xlu0 %v3039_v32, %s2830_s0 }
0x149e   :  { %997 = vrot.lane.b32.xlu0 %v995_v13, %s2830_s0 }
0x1504   :  { %v1098_v46 = vpop.permute.xlu0 %1097 }
0x1505   :  { %v1100_v47 = vadd.f32 %v1098_v46, %v1090_v45 }
0x1507   :  { %2581 = vtanh.f32 %v1100_v47 }
0x1508   :  { %v446_v48 = vpop.permute.xlu0 %445 }
0x1509   :  { %449 = vst.msk [vmem:[#allocation2] sm:$0xc] %vm448_vm5, %v446_v48 }
0x150c   :  { %v670_v49 = vpop.permute.xlu0 %669 }
0x150d   :  { %673 = vst.msk [vmem:[#allocation2] sm:$0xc0] %vm672_vm6, %v670_v49 }
0x1510   :  { %v998_v50 = vpop.permute.xlu0 %997 }
0x1511   :  { %1000 = vst.msk [vmem:[#allocation2 + $0x8] sm:$0x30] %vm560_vm7, %v998_v50 }
0x1514   :  { %v2582_v32 = vpop.eup %2581 }
0x1515   :  { %1103 = vrot.lane.b32.xlu1 %v2582_v32, %s2819_s22 }
0x1519   :  { %557 = vrot.lane.b32.xlu1 %v3020_v12, %s2830_s0  ;;  %v3118_v12 = vld [vmem:[%s3282_s7 + $0x8] sm:$0xff] }
0x151a   :  { %2410 = vmatpush3.msra.mxu0 %v3118_v12 }
0x151b   :  { %2411 = vmatprep.subr.mxu0 %v2828_v0 }
0x151c   :  { %2412 = vmatpush3.msra.mxu0 %v3127_v56 }
0x151d   :  { %886 = vrot.lane.b32.xlu1 %v3074_v8, %s2830_s0  ;;  %2414 = vmatmul.mubr.msk.f32.vlgmr.msra.gmra.mxu0 %vm232_vm3, %v1211_v57 }
0x151e   :  { %2427 = vmatprep.subr.mxu0 %v2828_v0  ;;  %2435 = vmatprep.mubr.msk.f32.mxu0 %vm2829_vm0, %v2828_v0 }
0x151f   :  { %2428 = vmatpush3.msra.mxu0 %v3106_v53 }
0x1520   :  { %2429 = vmatprep.subr.mxu0 %v2828_v0 }
0x1521   :  { %2430 = vmatpush3.msra.mxu0 %v3112_v55 }
0x1522   :  { %2431 = vmatprep.subr.mxu0 %v2828_v0 }
0x1523   :  { %2432 = vmatpush3.msra.mxu0 %v3118_v12 }
0x1524   :  { %2433 = vmatprep.subr.mxu0 %v2828_v0 }
0x1525   :  { %2434 = vmatpush3.msra.mxu0 %v3127_v56 }
0x1526   :  { %2449 = vmatprep.subr.mxu0 %v2828_v0 }
0x1587   :  { %v1104_v5 = vpop.permute.xlu1 %1103 }
0x1588   :  { %v1106_v58 = vmul.f32 %v2580_v42, %v1104_v5 }
0x158a   :  { %1108 = vrot.lane.b32.xlu1 %v1106_v58, %s2830_s0 }
0x158b   :  { %v558_v59 = vpop.permute.xlu1 %557 }
0x158c   :  { %561 = vst.msk [vmem:[#allocation2] sm:$0x30] %vm560_vm7, %v558_v59 }
0x158e   :  { %1296 = vrot.lane.b32.xlu1 %v1213_v6, %s2819_s22 }
0x158f   :  { %v887_v60 = vpop.permute.xlu1 %886 }
0x1590   :  { %889 = vst.msk [vmem:[#allocation2 + $0x8] sm:$0xc] %vm448_vm5, %v887_v60 }
0x1593   :  { %v1112_v61 = vld [vmem:[#allocation2] sm:$0xff] }
0x1594   :  { %2402 = vmatprep.mubr.msk.f32.mxu1 %vm232_vm3, %v1112_v61 }
0x15dd   :  { %v1283_v63 = vpop.f32.mrf.mxu0 }
0x15df   :  { %v2415_v1 = vpop.f32.mrf.mxu0 }
0x15fc   :  { %v1109_v7 = vpop.permute.xlu1 %1108 }
0x15fd   :  { %1111 = vst.msk [vmem:[#allocation2 + $0x8] sm:$0xc0] %vm672_vm6, %v1109_v7 }
0x1600   :  { %v1297_v22 = vpop.permute.xlu1 %1296 }
0x1604   :  { %v1113_v62 = vld [vmem:[#allocation2 + $0x8] sm:$0xff] }
0x1605   :  { %2403 = vmatmul.mubr.msk.f32.vlgmr.msra.gmra.mxu1 %vm232_vm3, %v1113_v62 }
0x1606   :  { %2417 = vmatpush3.msra.mxu1 %v3106_v53  ;;  %2424 = vmatprep.mubr.msk.f32.mxu1 %vm2829_vm0, %v2828_v0 }
0x1607   :  { %2418 = vmatprep.subr.mxu1 %v2828_v0 }
0x1608   :  { %2419 = vmatpush3.msra.mxu1 %v3112_v55 }
0x1609   :  { %2420 = vmatprep.subr.mxu1 %v2828_v0 }
0x160a   :  { %2421 = vmatpush3.msra.mxu1 %v3118_v12 }
0x160b   :  { %2422 = vmatprep.subr.mxu1 %v2828_v0 }
0x160c   :  { %2423 = vmatpush3.msra.mxu1 %v3127_v56 }
0x160d   :  { %2438 = vmatprep.subr.mxu1 %v2828_v0 }
0x16c5   :  { %v2404_v4 = vpop.f32.mrf.mxu1 }
0x16c6   :  { %v3163_v8 = vadd.f32 %v2404_v4, %v2186_v3 }
0x16c7   :  { %v1201_v9 = vpop.f32.mrf.mxu1 }
0x16c8   :  { %v3165_v10 = vadd.f32 %v2186_v3, %v1201_v9 }
0x16ca   :  { %v1287_v14 = vadd.f32 %v1283_v63, %v3165_v10 }
0x16cc   :  { %2583 = vtanh.f32 %v1287_v14  ;;  %v2190_v16 = vmul.f32 -1.442695, %v1287_v14 }
0x16ce   :  { %2585 = vpow2.f32 %v2190_v16 }
0x16d9   :  { %v2584_v15 = vpop.eup %2583 }
0x16da   :  { %1301 = vrot.lane.b32.xlu0 %v2584_v15, %s2819_s22 }
0x16db   :  { %v2586_v17 = vpop.eup %2585 }
0x16dc   :  { %v1291_v18 = vadd.f32 1.0, %v2586_v17 }
0x16de   :  { %2587 = vrcp.f32 %v1291_v18 }
0x16eb   :  { %v2588_v19 = vpop.eup %2587 }
0x16ec   :  { %v1299_v23 = vmul.f32 %v2588_v19, %v1297_v22 }
0x174c   :  { %v1302_v20 = vpop.permute.xlu0 %1301 }
0x174d   :  { %v1304_v21 = vmul.f32 %v2588_v19, %v1302_v20 }
0x174f   :  { %1306 = vrot.lane.b32.xlu0 %v1304_v21, %s2819_s22 }
0x17c1   :  { %v1307_v24 = vpop.permute.xlu0 %1306 }
0x17c2   :  { %v1309_v25 = vadd.f32 %v1307_v24, %v1299_v23 }
0x17c4   :  { %2589 = vtanh.f32 %v1309_v25  ;;  %v1403_v41 = vrot.slane %v1309_v25, 6 }
0x17d1   :  { %v2590_v26 = vpop.eup %2589 }
0x17d2   :  { %1312 = vrot.lane.b32.xlu1 %v2590_v26, %s2819_s22 }
0x1844   :  { %v1313_v27 = vpop.permute.xlu1 %1312 }
0x1845   :  { %v1315_v28 = vmul.f32 %v2588_v19, %v1313_v27 }
0x1847   :  { %1317 = vrot.lane.b32.xlu0 %v1315_v28, %s2830_s0 }
0x18b9   :  { %v1318_v29 = vpop.permute.xlu0 %1317 }
0x18ba   :  { %2425 = vmatmul.mubr.msk.f32.vlgmr.msra.gmra.mxu1 %vm232_vm3, %v1318_v29 }
0x18bb   :  { %2439 = vmatpush3.msra.mxu1 %v3106_v53  ;;  %2446 = vmatprep.mubr.msk.f32.mxu1 %vm2829_vm0, %v2828_v0 }
0x18bc   :  { %2440 = vmatprep.subr.mxu1 %v2828_v0 }
0x18bd   :  { %2441 = vmatpush3.msra.mxu1 %v3112_v55 }
0x18be   :  { %2442 = vmatprep.subr.mxu1 %v2828_v0 }
0x18bf   :  { %2443 = vmatpush3.msra.mxu1 %v3118_v12 }
0x18c0   :  { %2444 = vmatprep.subr.mxu1 %v2828_v0 }
0x18c1   :  { %2445 = vmatpush3.msra.mxu1 %v3127_v56 }
0x18c2   :  { %2460 = vmatprep.subr.mxu1 %v2828_v0 }
0x197a   :  { %v1387_v30 = vpop.f32.mrf.mxu1 }
0x197b   :  { %v1392_v13 = vrot.slane %v1387_v30, 6 }
0x197c   :  { %v2426_v31 = vpop.f32.mrf.mxu1 }
0x197d   :  { %v1394_v33 = vadd.f32 %v1392_v13, %v3165_v10 }
0x197f   :  { %2591 = vtanh.f32 %v1394_v33  ;;  %v2192_v35 = vmul.f32 -1.442695, %v1394_v33 }
0x1981   :  { %2593 = vpow2.f32 %v2192_v35 }
0x198c   :  { %v2592_v34 = vpop.eup %2591 }
0x198d   :  { %1407 = vrot.lane.b32.xlu1 %v2592_v34, %s2819_s22 }
0x198e   :  { %v2594_v36 = vpop.eup %2593 }
0x198f   :  { %v1398_v37 = vadd.f32 1.0, %v2594_v36 }
0x1991   :  { %2595 = vrcp.f32 %v1398_v37 }
0x199e   :  { %v2596_v38 = vpop.eup %2595 }
0x199f   :  { %v1405_v42 = vmul.f32 %v2596_v38, %v1403_v41 }
0x19ff   :  { %v1408_v39 = vpop.permute.xlu1 %1407 }
0x1a00   :  { %v1410_v40 = vmul.f32 %v2596_v38, %v1408_v39 }
0x1a02   :  { %1412 = vrot.lane.b32.xlu0 %v1410_v40, %s2819_s22 }
0x1a74   :  { %v1413_v43 = vpop.permute.xlu0 %1412 }
0x1a75   :  { %v1415_v44 = vadd.f32 %v1413_v43, %v1405_v42 }
0x1a77   :  { %2597 = vtanh.f32 %v1415_v44  ;;  %v1510_v6 = vrot.slane %v1415_v44, 6 }
0x1a84   :  { %v2598_v11 = vpop.eup %2597 }
0x1a85   :  { %1418 = vrot.lane.b32.xlu1 %v2598_v11, %s2819_s22 }
0x1af7   :  { %v1419_v45 = vpop.permute.xlu1 %1418 }
0x1af8   :  { %v1421_v46 = vmul.f32 %v2596_v38, %v1419_v45 }
0x1afa   :  { %v1423_v47 = vrot.slane %v1421_v46, 2 }
0x1afc   :  { %1424 = vrot.lane.b32.xlu0 %v1423_v47, %s2830_s0 }
0x1b6e   :  { %v1425_v48 = vpop.permute.xlu0 %1424 }
0x1b6f   :  { %2436 = vmatmul.mubr.msk.f32.vlgmr.msra.gmra.mxu0 %vm232_vm3, %v1425_v48 }
0x1b70   :  { %2450 = vmatpush3.msra.mxu0 %v3106_v53  ;;  %2457 = vmatprep.mubr.msk.f32.mxu0 %vm2829_vm0, %v2828_v0 }
0x1b71   :  { %2451 = vmatprep.subr.mxu0 %v2828_v0 }
0x1b72   :  { %2452 = vmatpush3.msra.mxu0 %v3112_v55 }
0x1b73   :  { %2453 = vmatprep.subr.mxu0 %v2828_v0 }
0x1b74   :  { %2454 = vmatpush3.msra.mxu0 %v3118_v12 }
0x1b75   :  { %2455 = vmatprep.subr.mxu0 %v2828_v0 }
0x1b76   :  { %2456 = vmatpush3.msra.mxu0 %v3127_v56 }
0x1b77   :  { %2471 = vmatprep.subr.mxu0 %v2828_v0 }
0x1c2f   :  { %v1494_v49 = vpop.f32.mrf.mxu0 }
0x1c30   :  { %v1499_v50 = vrot.slane %v1494_v49, 4 }
0x1c31   :  { %v2437_v32 = vpop.f32.mrf.mxu0 }
0x1c32   :  { %v1501_v51 = vadd.f32 %v1499_v50, %v3165_v10 }
0x1c34   :  { %2599 = vtanh.f32 %v1501_v51  ;;  %v2194_v54 = vmul.f32 -1.442695, %v1501_v51 }
0x1c36   :  { %2601 = vpow2.f32 %v2194_v54 }
0x1c41   :  { %v2600_v52 = vpop.eup %2599 }
0x1c42   :  { %1514 = vrot.lane.b32.xlu1 %v2600_v52, %s2819_s22 }
0x1c43   :  { %v2602_v2 = vpop.eup %2601 }
0x1c44   :  { %v1505_v57 = vadd.f32 1.0, %v2602_v2 }
0x1c46   :  { %2603 = vrcp.f32 %v1505_v57 }
0x1c53   :  { %v2604_v5 = vpop.eup %2603 }
0x1c54   :  { %v1512_v60 = vmul.f32 %v2604_v5, %v1510_v6 }
0x1cb4   :  { %v1515_v58 = vpop.permute.xlu1 %1514 }
0x1cb5   :  { %v1517_v59 = vmul.f32 %v2604_v5, %v1515_v58 }
0x1cb7   :  { %1519 = vrot.lane.b32.xlu0 %v1517_v59, %s2819_s22 }
0x1d29   :  { %v1520_v61 = vpop.permute.xlu0 %1519 }
0x1d2a   :  { %v1522_v7 = vadd.f32 %v1520_v61, %v1512_v60 }
0x1d2c   :  { %2605 = vtanh.f32 %v1522_v7  ;;  %v1617_v24 = vrot.slane %v1522_v7, 6 }
0x1d39   :  { %v2606_v62 = vpop.eup %2605 }
0x1d3a   :  { %1525 = vrot.lane.b32.xlu1 %v2606_v62, %s2819_s22 }
0x1dac   :  { %v1526_v63 = vpop.permute.xlu1 %1525 }
0x1dad   :  { %v1528_v1 = vmul.f32 %v2604_v5, %v1526_v63 }
0x1daf   :  { %v1530_v3 = vrot.slane %v1528_v1, 4 }
0x1db1   :  { %1531 = vrot.lane.b32.xlu0 %v1530_v3, %s2830_s0 }
0x1e23   :  { %v1532_v4 = vpop.permute.xlu0 %1531 }
0x1e24   :  { %2447 = vmatmul.mubr.msk.f32.vlgmr.msra.gmra.mxu1 %vm232_vm3, %v1532_v4 }
0x1e25   :  { %2461 = vmatpush3.msra.mxu1 %v3106_v53  ;;  %2468 = vmatprep.mubr.msk.f32.mxu1 %vm2829_vm0, %v2828_v0 }
0x1e26   :  { %2462 = vmatprep.subr.mxu1 %v2828_v0 }
0x1e27   :  { %2463 = vmatpush3.msra.mxu1 %v3112_v55 }
0x1e28   :  { %2464 = vmatprep.subr.mxu1 %v2828_v0 }
0x1e29   :  { %2465 = vmatpush3.msra.mxu1 %v3118_v12 }
0x1e2a   :  { %2466 = vmatprep.subr.mxu1 %v2828_v0 }
0x1e2b   :  { %2467 = vmatpush3.msra.mxu1 %v3127_v56 }
0x1e2c   :  { %2482 = vmatprep.subr.mxu1 %v2828_v0 }
0x1ee4   :  { %v1601_v9 = vpop.f32.mrf.mxu1 }
0x1ee5   :  { %v1606_v14 = vrot.slane %v1601_v9, 2 }
0x1ee6   :  { %v2448_v15 = vpop.f32.mrf.mxu1 }
0x1ee7   :  { %v1608_v16 = vadd.f32 %v1606_v14, %v3165_v10 }
0x1ee9   :  { %2607 = vtanh.f32 %v1608_v16  ;;  %v2196_v18 = vmul.f32 -1.442695, %v1608_v16 }
0x1eeb   :  { %2609 = vpow2.f32 %v2196_v18 }
0x1ef6   :  { %v2608_v17 = vpop.eup %2607 }
0x1ef7   :  { %1621 = vrot.lane.b32.xlu1 %v2608_v17, %s2819_s22 }
0x1ef8   :  { %v2610_v19 = vpop.eup %2609 }
0x1ef9   :  { %v1612_v20 = vadd.f32 1.0, %v2610_v19 }
0x1efb   :  { %2611 = vrcp.f32 %v1612_v20 }
0x1f08   :  { %v2612_v21 = vpop.eup %2611 }
0x1f09   :  { %v1619_v25 = vmul.f32 %v2612_v21, %v1617_v24 }
0x1f69   :  { %v1622_v22 = vpop.permute.xlu1 %1621 }
0x1f6a   :  { %v1624_v23 = vmul.f32 %v2612_v21, %v1622_v22 }
0x1f6c   :  { %1626 = vrot.lane.b32.xlu0 %v1624_v23, %s2819_s22 }
0x1fde   :  { %v1627_v26 = vpop.permute.xlu0 %1626 }
0x1fdf   :  { %v1629_v27 = vadd.f32 %v1627_v26, %v1619_v25 }
0x1fe1   :  { %2613 = vtanh.f32 %v1629_v27  ;;  %v1721_v42 = vrot.slane %v1629_v27, 6 }
0x1fee   :  { %v2614_v10 = vpop.eup %2613 }
0x1fef   :  { %1632 = vrot.lane.b32.xlu1 %v2614_v10, %s2819_s22 }
0x2061   :  { %v1633_v28 = vpop.permute.xlu1 %1632 }
0x2062   :  { %v1635_v29 = vmul.f32 %v2612_v21, %v1633_v28 }
0x2064   :  { %v1637_v30 = vrot.slane %v1635_v29, 6 }
0x2066   :  { %1638 = vrot.lane.b32.xlu0 %v1637_v30, %s2830_s0 }
0x20d8   :  { %v1639_v13 = vpop.permute.xlu0 %1638 }
0x20d9   :  { %2458 = vmatmul.mubr.msk.f32.vlgmr.msra.gmra.mxu0 %vm232_vm3, %v1639_v13 }
0x20da   :  { %2472 = vmatpush3.msra.mxu0 %v3106_v53  ;;  %2479 = vmatprep.mubr.msk.f32.mxu0 %vm2829_vm0, %v2828_v0 }
0x20db   :  { %2473 = vmatprep.subr.mxu0 %v2828_v0 }
0x20dc   :  { %2474 = vmatpush3.msra.mxu0 %v3112_v55 }
0x20dd   :  { %2475 = vmatprep.subr.mxu0 %v2828_v0 }
0x20de   :  { %2476 = vmatpush3.msra.mxu0 %v3118_v12 }
0x20df   :  { %2477 = vmatprep.subr.mxu0 %v2828_v0 }
0x20e0   :  { %2478 = vmatpush3.msra.mxu0 %v3127_v56 }
0x20e1   :  { %2493 = vmatprep.subr.mxu0 %v2828_v0 }
0x2199   :  { %v1708_v31 = vpop.f32.mrf.mxu0 }
0x219a   :  { %v1712_v33 = vadd.f32 %v1708_v31, %v3163_v8 }
0x219b   :  { %v2459_v34 = vpop.f32.mrf.mxu0 }
0x219c   :  { %2615 = vtanh.f32 %v1712_v33  ;;  %v2198_v36 = vmul.f32 -1.442695, %v1712_v33 }
0x219e   :  { %2617 = vpow2.f32 %v2198_v36 }
0x21a9   :  { %v2616_v35 = vpop.eup %2615 }
0x21aa   :  { %1725 = vrot.lane.b32.xlu1 %v2616_v35, %s2819_s22 }
0x21ab   :  { %v2618_v37 = vpop.eup %2617 }
0x21ac   :  { %v1716_v38 = vadd.f32 1.0, %v2618_v37 }
0x21ae   :  { %2619 = vrcp.f32 %v1716_v38 }
0x21bb   :  { %v2620_v39 = vpop.eup %2619 }
0x21bc   :  { %v1723_v43 = vmul.f32 %v2620_v39, %v1721_v42 }
0x221c   :  { %v1726_v40 = vpop.permute.xlu1 %1725 }
0x221d   :  { %v1728_v41 = vmul.f32 %v2620_v39, %v1726_v40 }
0x221f   :  { %1730 = vrot.lane.b32.xlu0 %v1728_v41, %s2819_s22 }
0x2291   :  { %v1731_v44 = vpop.permute.xlu0 %1730 }
0x2292   :  { %v1733_v11 = vadd.f32 %v1731_v44, %v1723_v43  ;;  %v2062_v43 = vld [vmem:[#allocation14 + $0x10] sm:$0xff]  ;;  %v2061_v44 = vld [vmem:[#allocation14 + $0x8] sm:$0xff] }
0x2294   :  { %2621 = vtanh.f32 %v1733_v11 }
0x22a1   :  { %v2622_v45 = vpop.eup %2621 }
0x22a2   :  { %1736 = vrot.lane.b32.xlu1 %v2622_v45, %s2819_s22 }
0x2314   :  { %v1737_v46 = vpop.permute.xlu1 %1736 }
0x2315   :  { %v1739_v47 = vmul.f32 %v2620_v39, %v1737_v46 }
0x2317   :  { %1741 = vrot.lane.b32.xlu0 %v1739_v47, %s2830_s0 }
0x2389   :  { %v1742_v48 = vpop.permute.xlu0 %1741 }
0x238a   :  { %2469 = vmatmul.mubr.msk.f32.vlgmr.msra.gmra.mxu1 %vm232_vm3, %v1742_v48 }
0x238b   :  { %2483 = vmatpush3.msra.mxu1 %v3106_v53  ;;  %2490 = vmatprep.mubr.msk.f32.mxu1 %vm2829_vm0, %v2828_v0 }
0x238c   :  { %2484 = vmatprep.subr.mxu1 %v2828_v0 }
0x238d   :  { %2485 = vmatpush3.msra.mxu1 %v3112_v55 }
0x238e   :  { %2486 = vmatprep.subr.mxu1 %v2828_v0 }
0x238f   :  { %2487 = vmatpush3.msra.mxu1 %v3118_v12 }
0x2390   :  { %2488 = vmatprep.subr.mxu1 %v2828_v0 }
0x2391   :  { %2489 = vmatpush3.msra.mxu1 %v3127_v56  ;;  %v1827_v56 = vrot.slane %v1733_v11, 6  ;;  %v2060_v11 = vld [vmem:[#allocation14] sm:$0xff] }
0x244a   :  { %v1811_v49 = vpop.f32.mrf.mxu1 }
0x244b   :  { %v1816_v50 = vrot.slane %v1811_v49, 6 }
0x244c   :  { %v2470_v32 = vpop.f32.mrf.mxu1 }
0x244d   :  { %v1818_v53 = vadd.f32 %v1816_v50, %v3163_v8  ;;  %v2205_v50 = vld [vmem:[%s3285_s10] ss:$0 sm:$0xff] }
0x244f   :  { %2623 = vtanh.f32 %v1818_v53  ;;  %v2200_v52 = vmul.f32 -1.442695, %v1818_v53 }
0x2451   :  { %2625 = vpow2.f32 %v2200_v52 }
0x245c   :  { %v2624_v51 = vpop.eup %2623 }
0x245d   :  { %1831 = vrot.lane.b32.xlu1 %v2624_v51, %s2819_s22 }
0x245e   :  { %v2626_v55 = vpop.eup %2625 }
0x245f   :  { %v1822_v54 = vadd.f32 1.0, %v2626_v55 }
0x2461   :  { %2627 = vrcp.f32 %v1822_v54 }
0x246e   :  { %v2628_v2 = vpop.eup %2627 }
0x246f   :  { %v1829_v5 = vmul.f32 %v2628_v2, %v1827_v56 }
0x24cf   :  { %v1832_v12 = vpop.permute.xlu1 %1831 }
0x24d0   :  { %v1834_v57 = vmul.f32 %v2628_v2, %v1832_v12 }
0x24d2   :  { %1836 = vrot.lane.b32.xlu0 %v1834_v57, %s2819_s22 }
0x2544   :  { %v1837_v58 = vpop.permute.xlu0 %1836 }
0x2545   :  { %v1839_v59 = vadd.f32 %v1837_v58, %v1829_v5 }
0x2547   :  { %2629 = vtanh.f32 %v1839_v59  ;;  %v1934_v20 = vrot.slane %v1839_v59, 6 }
0x2554   :  { %v2630_v6 = vpop.eup %2629 }
0x2555   :  { %1842 = vrot.lane.b32.xlu1 %v2630_v6, %s2819_s22 }
0x25c7   :  { %v1843_v60 = vpop.permute.xlu1 %1842 }
0x25c8   :  { %v1845_v61 = vmul.f32 %v2628_v2, %v1843_v60 }
0x25ca   :  { %v1847_v7 = vrot.slane %v1845_v61, 2 }
0x25cc   :  { %1848 = vrot.lane.b32.xlu0 %v1847_v7, %s2830_s0 }
0x263e   :  { %v1849_v62 = vpop.permute.xlu0 %1848 }
0x263f   :  { %2480 = vmatmul.mubr.msk.f32.vlgmr.msra.gmra.mxu0 %vm232_vm3, %v1849_v62 }
0x2640   :  { %2501 = vmatprep.mubr.msk.f32.mxu0 %vm2829_vm0, %v2828_v0 }
0x26ff   :  { %v1918_v63 = vpop.f32.mrf.mxu0 }
0x2700   :  { %v1923_v1 = vrot.slane %v1918_v63, 4 }
0x2701   :  { %v2481_v3 = vpop.f32.mrf.mxu0 }
0x2702   :  { %v1925_v4 = vadd.f32 %v1923_v1, %v3163_v8 }
0x2704   :  { %2631 = vtanh.f32 %v1925_v4  ;;  %v2202_v14 = vmul.f32 -1.442695, %v1925_v4 }
0x2706   :  { %2633 = vpow2.f32 %v2202_v14 }
0x2711   :  { %v2632_v9 = vpop.eup %2631 }
0x2712   :  { %1938 = vrot.lane.b32.xlu1 %v2632_v9, %s2819_s22 }
0x2713   :  { %v2634_v15 = vpop.eup %2633 }
0x2714   :  { %v1929_v16 = vadd.f32 1.0, %v2634_v15 }
0x2716   :  { %2635 = vrcp.f32 %v1929_v16 }
0x2723   :  { %v2636_v17 = vpop.eup %2635 }
0x2724   :  { %v1936_v21 = vmul.f32 %v2636_v17, %v1934_v20 }
0x2784   :  { %v1939_v18 = vpop.permute.xlu1 %1938 }
0x2785   :  { %v1941_v19 = vmul.f32 %v2636_v17, %v1939_v18 }
0x2787   :  { %1943 = vrot.lane.b32.xlu0 %v1941_v19, %s2819_s22 }
0x27f9   :  { %v1944_v22 = vpop.permute.xlu0 %1943 }
0x27fa   :  { %v1946_v23 = vadd.f32 %v1944_v22, %v1936_v21 }
0x27fc   :  { %2637 = vtanh.f32 %v1946_v23  ;;  %v2041_v39 = vrot.slane %v1946_v23, 6 }
0x2809   :  { %v2638_v24 = vpop.eup %2637 }
0x280a   :  { %1949 = vrot.lane.b32.xlu1 %v2638_v24, %s2819_s22 }
0x287c   :  { %v1950_v25 = vpop.permute.xlu1 %1949 }
0x287d   :  { %v1952_v26 = vmul.f32 %v2636_v17, %v1950_v25 }
0x287f   :  { %v1954_v27 = vrot.slane %v1952_v26, 4 }
0x2881   :  { %1955 = vrot.lane.b32.xlu0 %v1954_v27, %s2830_s0 }
0x28f3   :  { %v1956_v10 = vpop.permute.xlu0 %1955 }
0x28f4   :  { %2491 = vmatmul.mubr.msk.f32.vlgmr.msra.gmra.mxu1 %vm232_vm3, %v1956_v10 }
0x29b4   :  { %v2025_v28 = vpop.f32.mrf.mxu1 }
0x29b5   :  { %v2030_v29 = vrot.slane %v2025_v28, 2 }
0x29b6   :  { %v2492_v30 = vpop.f32.mrf.mxu1 }
0x29b7   :  { %v2032_v13 = vadd.f32 %v2030_v29, %v3163_v8  ;;  %v2063_v8 = vld [vmem:[#allocation14 + $0x18] sm:$0xff] }
0x29b8   :  { %2494 = vmatpush3.msra.mxu0 %v2063_v8 }
0x29b9   :  { %2639 = vtanh.f32 %v2032_v13  ;;  %v2204_v33 = vmul.f32 -1.442695, %v2032_v13  ;;  %2495 = vmatprep.subr.mxu0 %v2828_v0 }
0x29ba   :  { %2496 = vmatpush3.msra.mxu0 %v2062_v43 }
0x29bb   :  { %2641 = vpow2.f32 %v2204_v33  ;;  %2497 = vmatprep.subr.mxu0 %v2828_v0 }
0x29bc   :  { %2498 = vmatpush3.msra.mxu0 %v2061_v44 }
0x29bd   :  { %2499 = vmatprep.subr.mxu0 %v2828_v0 }
0x29be   :  { %2500 = vmatpush3.msra.mxu0 %v2060_v11 }
0x29c6   :  { %v2640_v31 = vpop.eup %2639 }
0x29c7   :  { %2045 = vrot.lane.b32.xlu1 %v2640_v31, %s2819_s22 }
0x29c8   :  { %v2642_v34 = vpop.eup %2641 }
0x29c9   :  { %v2036_v35 = vadd.f32 1.0, %v2642_v34 }
0x29cb   :  { %2643 = vrcp.f32 %v2036_v35 }
0x29d8   :  { %v2644_v36 = vpop.eup %2643 }
0x29d9   :  { %v2043_v40 = vmul.f32 %v2644_v36, %v2041_v39 }
0x2a39   :  { %v2046_v37 = vpop.permute.xlu1 %2045 }
0x2a3a   :  { %v2048_v38 = vmul.f32 %v2644_v36, %v2046_v37 }
0x2a3c   :  { %2050 = vrot.lane.b32.xlu0 %v2048_v38, %s2819_s22 }
0x2aae   :  { %v2051_v41 = vpop.permute.xlu0 %2050 }
0x2aaf   :  { %v2053_v42 = vadd.f32 %v2051_v41, %v2043_v40 }
0x2ab1   :  { %2645 = vtanh.f32 %v2053_v42 }
0x2abe   :  { %v2646_v45 = vpop.eup %2645 }
0x2abf   :  { %2056 = vrot.lane.b32.xlu1 %v2646_v45, %s2819_s22  ;;  %s2787_s22 = scalar_lea.vmem %s2155_s29, 32 }
0x2ac0   :  { %p2788_p7 = scmp.ne.s32.totalorder %s2155_s29, %s2787_s22  ;;  %p2793_p9 = scmp.lt.s32.totalorder %s2787_s22, %s2787_s22 }
0x2ac2   :  { %p2794_p10 = por %p2793_p9, %p2792_p8 }
0x2ac4   :  { %p2795_p11 = pnand %p2794_p10, %p2788_p7 }
0x2b31   :  { %v2057_v46 = vpop.permute.xlu1 %2056 }
0x2b32   :  { %v2059_v47 = vmul.f32 %v2644_v36, %v2057_v46 }
0x2b34   :  { %v2072_v48 = vrot.slane %v2059_v47, 6 }
0x2b36   :  { %2073 = vrot.lane.b32.xlu0 %v2072_v48, %s2830_s0 }
0x2ba8   :  { %v2074_v49 = vpop.permute.xlu0 %2073 }
0x2ba9   :  { %2502 = vmatmul.mubr.msk.f32.vlgmr.msra.gmra.mxu0 %vm232_vm3, %v2074_v49 }
0x2c69   :  { %v2143_v32 = vpop.f32.mrf.mxu0 }
0x2c6a   :  { %v2144_v0 = vadd.f32 %v2205_v50, %v2143_v32 }
0x2c6b   :  { %v2503_v53 = vpop.f32.mrf.mxu0 }
0x2c6c   :  { %2147 = vst [vmem:[#allocation15] sm:$0x3] %v2144_v0 }
0x2c6d   :  { %2798 = shalt.err (!%p2795_p11)
}
0x2c6e   :  { %2157 = dma.vmem_to_hbm [thread:$0]  %s2155_s29, 32, %s3286_s11, [#allocation5]  }
0x2c6f   :  { %2815 = dma.done.wait [#allocation5], 32  }
0x2c70   :  { %2816 = vsyncadd [#allocation5], 4294967264 }
0x2c71   :  { %2161 = vsyncpa [#allocation4], 1 }
0x2c72   :  { %2162 = vsyncpa [#allocation7], 1 }
0x2c73   :  { %2163 = vsyncpa [#allocation10], 1 }
0x2c74   :  { %2164 = vsyncpa [#allocation13], 1 }
0x2c75   :  { %2165 = vsyncpa [#allocation5], 1 }

</bundles_post_ra>
